<compile_context>
chip_gen: v5e
topology: v5e:2x2
jax: 0.10.0
libtpu: 0.0.40
codegen_flags: <defaults>
</compile_context>

<pallas_src>
import functools

import jax
import jax.numpy as jnp
from jax.experimental import pallas as pl
from jax.experimental.pallas import tpu as pltpu

EPS = 1e-5


# ----------------------------------------------------------------------------- hw query

@functools.lru_cache(maxsize=1)
def _vmem_capacity_bytes():
    try:
        info = pltpu.get_tpu_info()
        cap = int(getattr(info, "vmem_capacity_bytes", 0) or 0)
        if cap > 0:
            return cap
    except Exception:
        pass
    return 128 << 20  # conservative default (v5e/v6e)


def _pick_tile_n(N, L, Cp, vmem_cap):
    """Largest batch-tile that (a) divides N, (b) keeps ~9 live f32-equivalent tiles
    plus weights under ~vmem_cap/4, (c) leaves >=2 grid steps only on small-VMEM
    (v7x-class, 2 TC/chip) parts where megacore sharding pays off."""
    budget = max(vmem_cap // 4, 4 << 20)
    tile_f32 = L * Cp * 4
    w_bytes = 4 * 3 * Cp * Cp * 4
    avail = max(budget - w_bytes, tile_f32)
    live_factor = 9   # 2x in + 2x out (pipelined) + residual + shifted copies + acc
    tn = max(1, avail // (live_factor * tile_f32))
    tn = int(min(tn, N))
    while N % tn:
        tn -= 1
    if vmem_cap <= (64 << 20) and tn == N and N > 1:   # v7x-class: keep both TCs busy
        tn = N // 2
        while N % tn:
            tn -= 1
    return tn


def _vmem_limit(tn, L, Cp, vmem_cap):
    est = 9 * tn * L * Cp * 4 + 4 * 3 * Cp * Cp * 4 + (2 << 20)
    cap = int(vmem_cap * 0.8)          # ~100 MiB on 128 MiB parts, ~51 MiB on v7x
    return int(max(min(2 * est, cap), min(32 << 20, cap)))


# ----------------------------------------------------------------------------- kernels

def _make_conv_stage_kernel(apply_act, add_residual, L, Cp, compute_dtype):
    """One conv stage: optionally apply the previous BN (folded scale/shift) + ReLU,
    run the 3-tap reflect conv as a single K=3*Cp MXU matmul (operand built in-value,
    no scratch), add bias (and residual), write pre-BN activations (possibly bf16)
    and per-tile f32 BN partial statistics."""

    def kernel(*refs):
        it = iter(refs)
        h_ref = next(it)
        scale_ref = next(it) if apply_act else None
        shift_ref = next(it) if apply_act else None
        w_ref = next(it)
        b_ref = next(it)
        res_ref = next(it) if add_residual else None
        y_ref, s1_ref, s2_ref = next(it), next(it), next(it)

        h = h_ref[...].astype(jnp.float32)                       # (tn, L, Cp)
        if apply_act:
            # previous stage's BatchNorm + ReLU folded into one FMA + max (f32)
            h = jnp.maximum(h * scale_ref[...] + shift_ref[...], 0.0)

        hc = h.astype(compute_dtype)
        # Reflect padding along L: left neighbor of 0 is h[:,1]; right neighbor of
        # L-1 is h[:,L-2].  Build [left | center | right] along the LANE axis
        # (Cp % 128 == 0 -> layout-free concat) so the 3 taps are ONE matmul
        # with K = 3*Cp, no VMEM scratch round-trip.
        left = jnp.concatenate([hc[:, 1:2, :], hc[:, :L - 1, :]], axis=1)
        right = jnp.concatenate([hc[:, 1:, :], hc[:, L - 2:L - 1, :]], axis=1)
        h3 = jnp.concatenate([left, hc, right], axis=-1)          # (tn, L, 3*Cp)

        tn = h3.shape[0]
        xmat = h3.reshape(tn * L, 3 * Cp)
        y = jnp.dot(xmat, w_ref[...], preferred_element_type=jnp.float32)
        y = y.reshape(tn, L, Cp) + b_ref[...]                     # bias in f32
        if add_residual:
            y = y + res_ref[...].astype(jnp.float32)              # residual in f32

        # single-pass BN partial statistics (f32, computed before any bf16 downcast)
        s1_ref[...] = jnp.sum(y, axis=(0, 1)).reshape(1, 1, Cp)
        s2_ref[...] = jnp.sum(y * y, axis=(0, 1)).reshape(1, 1, Cp)
        y_ref[...] = y.astype(y_ref.dtype)

    return kernel


def _make_bn_relu_kernel(C):
    def kernel(h_ref, scale_ref, shift_ref, o_ref):
        h = h_ref[...].astype(jnp.float32)
        y = jnp.maximum(h * scale_ref[...] + shift_ref[...], 0.0)
        o_ref[...] = y[:, :, :C].astype(o_ref.dtype)              # drop channel pad here
    return kernel


# ----------------------------------------------------------------------------- helpers

def _bn_fold(s1, s2, count, gamma_p, beta_p):
    """Fold train-mode BatchNorm into per-channel scale/shift from global sums.
    Note: single-pass E[y^2]-mean^2 in f32; max(...,0) guards tiny negatives."""
    mean = s1 / count
    var = jnp.maximum(s2 / count - mean * mean, 0.0)
    scale = gamma_p * jax.lax.rsqrt(var + EPS)
    shift = beta_p - mean * scale
    cp = s1.shape[-1]
    return scale.reshape(1, 1, cp), shift.reshape(1, 1, cp)


# ----------------------------------------------------------------------------- stages

def _conv_stage(h, w_p, b_p, *, scale=None, shift=None, residual=None,
                out_dtype=jnp.float32, vmem_cap=128 << 20):
    N_, L_, Cp_ = h.shape
    apply_act = scale is not None
    add_res = residual is not None
    tn = _pick_tile_n(N_, L_, Cp_, vmem_cap)
    n_tiles = N_ // tn

    tile_spec = pl.BlockSpec((tn, L_, Cp_), lambda i: (i, 0, 0))
    vec_spec = pl.BlockSpec((1, 1, Cp_), lambda i: (0, 0, 0))
    stat_spec = pl.BlockSpec((1, 1, Cp_), lambda i: (i, 0, 0))
    w_spec = pl.BlockSpec((3 * Cp_, Cp_), lambda i: (0, 0))

    args, in_specs = [h], [tile_spec]
    if apply_act:
        args += [scale, shift]
        in_specs += [vec_spec, vec_spec]
    args += [w_p, b_p]
    in_specs += [w_spec, vec_spec]
    if add_res:
        args += [residual]
        in_specs += [tile_spec]

    grid_spec = pltpu.PrefetchScalarGridSpec(
        num_scalar_prefetch=0,
        grid=(n_tiles,),
        in_specs=in_specs,
        out_specs=[tile_spec, stat_spec, stat_spec],
    )
    y, s1, s2 = pl.pallas_call(
        _make_conv_stage_kernel(apply_act, add_res, L_, Cp_, w_p.dtype),
        grid_spec=grid_spec,
        out_shape=(
            jax.ShapeDtypeStruct((N_, L_, Cp_), out_dtype),
            jax.ShapeDtypeStruct((n_tiles, 1, Cp_), jnp.float32),
            jax.ShapeDtypeStruct((n_tiles, 1, Cp_), jnp.float32),
        ),
        compiler_params=pltpu.CompilerParams(
            dimension_semantics=("parallel",),
            vmem_limit_bytes=_vmem_limit(tn, L_, Cp_, vmem_cap)),
    )(*args)
    # global per-channel reduce of the per-tile partials (tiny, done in XLA glue)
    return y, jnp.sum(s1, axis=0), jnp.sum(s2, axis=0)            # each (1, Cp)


def _bn_relu_stage(h, scale, shift, C, *, vmem_cap=128 << 20):
    N_, L_, Cp_ = h.shape
    tn = _pick_tile_n(N_, L_, Cp_, vmem_cap)
    n_tiles = N_ // tn
    tile_in = pl.BlockSpec((tn, L_, Cp_), lambda i: (i, 0, 0))
    tile_out = pl.BlockSpec((tn, L_, C), lambda i: (i, 0, 0))
    vec_spec = pl.BlockSpec((1, 1, Cp_), lambda i: (0, 0, 0))
    grid_spec = pltpu.PrefetchScalarGridSpec(
        num_scalar_prefetch=0,
        grid=(n_tiles,),
        in_specs=[tile_in, vec_spec, vec_spec],
        out_specs=tile_out,
    )
    return pl.pallas_call(
        _make_bn_relu_kernel(C),
        grid_spec=grid_spec,
        out_shape=jax.ShapeDtypeStruct((N_, L_, C), jnp.float32),
        compiler_params=pltpu.CompilerParams(
            dimension_semantics=("parallel",),
            vmem_limit_bytes=_vmem_limit(tn, L_, Cp_, vmem_cap)),
    )(h, scale, shift)


# ----------------------------------------------------------------------------- wrapper

def resblock_pallas(x_ncl, params, use_bf16=True):
    """x_ncl: (N, C, L) float32.  params: torch-layout conv/bn parameters.
    use_bf16=True: bf16 MXU matmuls + bf16 inter-stage activations (f32 stats/res)."""
    N, C, L = x_ncl.shape
    if L < 2:
        raise ValueError("reflect padding requires L >= 2")
    Cp = ((C + 127) // 128) * 128                       # lane-dense channel padding
    vmem_cap = _vmem_capacity_bytes()
    act_dtype = jnp.bfloat16 if use_bf16 else jnp.float32
    w_dtype = jnp.bfloat16 if use_bf16 else jnp.float32

    x_nlc = jnp.transpose(x_ncl, (0, 2, 1)).astype(jnp.float32)   # NCL -> NLC
    x_p = jnp.pad(x_nlc, ((0, 0), (0, 0), (0, Cp - C)))           # f32 (residual source)

    def prep_conv(w, b):
        # torch (C_out, C_in, 3) -> taps stacked along C_in: (3*Cp, Cp)
        w_t = jnp.transpose(w, (2, 1, 0)).astype(jnp.float32)      # (3, Cin, Cout)
        w_pad = jnp.pad(w_t, ((0, 0), (0, Cp - C), (0, Cp - C)))
        b_pad = jnp.pad(b.astype(jnp.float32), (0, Cp - C))
        return w_pad.reshape(3 * Cp, Cp).astype(w_dtype), b_pad.reshape(1, 1, Cp)

    def prep_bn(g, be):
        # zero-padding gamma keeps the padded lanes exactly zero through the fold
        return (jnp.pad(g.astype(jnp.float32), (0, Cp - C)),
                jnp.pad(be.astype(jnp.float32), (0, Cp - C)))

    w1, b1 = prep_conv(params["w1"], params["b1"]); g1, be1 = prep_bn(params["g1"], params["be1"])
    w2, b2 = prep_conv(params["w2"], params["b2"]); g2, be2 = prep_bn(params["g2"], params["be2"])
    w3, b3 = prep_conv(params["w3"], params["b3"]); g3, be3 = prep_bn(params["g3"], params["be3"])

    count = float(N * L)

    # stage 1: conv1 on raw x (no activation), pre-BN activations + partial stats
    y1, a1, q1 = _conv_stage(x_p, w1, b1, out_dtype=act_dtype, vmem_cap=vmem_cap)
    sc1, sh1 = _bn_fold(a1, q1, count, g1, be1)
    # stage 2: BN1+ReLU folded into the conv2 pass
    y2, a2, q2 = _conv_stage(y1, w2, b2, scale=sc1, shift=sh1,
                             out_dtype=act_dtype, vmem_cap=vmem_cap)
    sc2, sh2 = _bn_fold(a2, q2, count, g2, be2)
    # stage 3: BN2+ReLU folded into conv3, residual add re-reads the f32 x tile
    y3, a3, q3 = _conv_stage(y2, w3, b3, scale=sc2, shift=sh2, residual=x_p,
                             out_dtype=act_dtype, vmem_cap=vmem_cap)
    sc3, sh3 = _bn_fold(a3, q3, count, g3, be3)
    # stage 4: final BN3 + ReLU, writes the UNPADDED (N, L, C) tensor
    out_nlc = _bn_relu_stage(y3, sc3, sh3, C, vmem_cap=vmem_cap)

    # TODO(synk): BatchNorm1d running_mean/running_var buffer updates (training-time
    # side effect) are not modeled; normalization uses batch stats like the reference.
    return jnp.transpose(out_nlc, (0, 2, 1))            # NLC -> NCL (already unpadded)


# ----------------------------------------------------------------------------- reference

def resblock_reference(x_ncl, params):
    """Pure-JAX reference mirroring PyTorch semantics (NCL layout)."""
    def conv(h, w, b):
        hp = jnp.pad(h, ((0, 0), (0, 0), (1, 1)), mode="reflect")
        y = jax.lax.conv_general_dilated(
            hp, w, window_strides=(1,), padding="VALID",
            dimension_numbers=("NCH", "OIH", "NCH"))
        return y + b[None, :, None]

    def bn(h, g, be):
        mean = jnp.mean(h, axis=(0, 2), keepdims=True)
        var = jnp.mean((h - mean) ** 2, axis=(0, 2), keepdims=True)
        return (h - mean) / jnp.sqrt(var + EPS) * g[None, :, None] + be[None, :, None]

    residual = x_ncl
    h = jax.nn.relu(bn(conv(x_ncl, params["w1"], params["b1"]), params["g1"], params["be1"]))
    h = jax.nn.relu(bn(conv(h, params["w2"], params["b2"]), params["g2"], params["be2"]))
    h = conv(h, params["w3"], params["b3"])
    h = residual + h
    return jax.nn.relu(bn(h, params["g3"], params["be3"]))


def init_params(key, C):
    ks = jax.random.split(key, 6)
    scale = 1.0 / jnp.sqrt(3.0 * C)
    params = {}
    for i, name in enumerate(("1", "2", "3")):
        params["w" + name] = jax.random.uniform(
            ks[2 * i], (C, C, 3), jnp.float32, -scale, scale)
        params["b" + name] = jax.random.uniform(
            ks[2 * i + 1], (C,), jnp.float32, -scale, scale)
        params["g" + name] = jnp.ones((C,), jnp.float32)    # BN weight init
        params["be" + name] = jnp.zeros((C,), jnp.float32)  # BN bias init
    return params


if __name__ == "__main__":
    key = jax.random.PRNGKey(0)
    kx, kp = jax.random.split(key)

    N, C, L = 2, 8, 16
    x = jax.random.normal(kx, (N, C, L), jnp.float32)
    params = init_params(kp, C)

    ref = resblock_reference(x, params)

    # f32 path: exact-structure check against the pure-JAX reference.
    fwd_f32 = jax.jit(lambda xx, pp: resblock_pallas(xx, pp, use_bf16=False))
    out_f32 = jax.block_until_ready(fwd_f32(x, params))
    assert out_f32.shape == (N, C, L)
    err_f32 = float(jnp.max(jnp.abs(out_f32 - ref)))
    assert jnp.allclose(out_f32, ref, rtol=1e-4, atol=1e-4), f"f32 max abs err = {err_f32}"

    # bf16 fast path (default): bf16 MXU + bf16 intermediates -> looser tolerance.
    fwd_bf16 = jax.jit(lambda xx, pp: resblock_pallas(xx, pp, use_bf16=True))
    out_bf16 = jax.block_until_ready(fwd_bf16(x, params))
    assert out_bf16.shape == (N, C, L)
    err_bf16 = float(jnp.max(jnp.abs(out_bf16 - ref)))
    assert jnp.allclose(out_bf16, ref, rtol=1e-1, atol=1e-1), f"bf16 max abs err = {err_bf16}"

    print("KERNEL_OK")
</pallas_src>

<mosaic_0001>
module attributes {stable_mosaic.version = 11 : i64} {
  func.func @kernel(%arg0: i32, %arg1: memref<2x16x128xf32, #tpu.memory_space<vmem>>, %arg2: memref<1x1x128xf32, #tpu.memory_space<vmem>>, %arg3: memref<1x1x128xf32, #tpu.memory_space<vmem>>, %arg4: memref<384x128xf32, #tpu.memory_space<vmem>>, %arg5: memref<1x1x128xf32, #tpu.memory_space<vmem>>, %arg6: memref<2x16x128xf32, #tpu.memory_space<vmem>>, %arg7: memref<1x1x128xf32, #tpu.memory_space<vmem>>, %arg8: memref<1x1x128xf32, #tpu.memory_space<vmem>>) attributes {dimension_semantics = [#tpu.dimension_semantics<parallel>], iteration_bounds = array<i64: 1>, scalar_prefetch = 0 : i64, scratch_operands = 0 : i64, tpu.core_type = #tpu.core_type<tc>, window_params = [{transform_indices = @transform_0, window_bounds = array<i64: 2, 16, 128>}, {pipeline_mode = #tpu.pipeline_mode<synchronous>, transform_indices = @transform_1, window_bounds = array<i64: 1, 1, 128>}, {pipeline_mode = #tpu.pipeline_mode<synchronous>, transform_indices = @transform_2, window_bounds = array<i64: 1, 1, 128>}, {pipeline_mode = #tpu.pipeline_mode<synchronous>, transform_indices = @transform_3, window_bounds = array<i64: 384, 128>}, {pipeline_mode = #tpu.pipeline_mode<synchronous>, transform_indices = @transform_4, window_bounds = array<i64: 1, 1, 128>}, {transform_indices = @transform_5, window_bounds = array<i64: 2, 16, 128>}, {transform_indices = @transform_6, window_bounds = array<i64: 1, 1, 128>}, {transform_indices = @transform_7, window_bounds = array<i64: 1, 1, 128>}]} {
    %c0 = arith.constant 0 : index
    %c0_0 = arith.constant 0 : index
    %c0_1 = arith.constant 0 : index
    %0 = vector.load %arg1[%c0, %c0_0, %c0_1] : memref<2x16x128xf32, #tpu.memory_space<vmem>>, vector<2x16x128xf32>
    %c0_2 = arith.constant 0 : index
    %c0_3 = arith.constant 0 : index
    %c0_4 = arith.constant 0 : index
    %1 = vector.load %arg2[%c0_2, %c0_3, %c0_4] : memref<1x1x128xf32, #tpu.memory_space<vmem>>, vector<1x1x128xf32>
    %2 = vector.broadcast %1 : vector<1x1x128xf32> to vector<2x16x128xf32>
    %3 = arith.mulf %0, %2 : vector<2x16x128xf32>
    %c0_5 = arith.constant 0 : index
    %c0_6 = arith.constant 0 : index
    %c0_7 = arith.constant 0 : index
    %4 = vector.load %arg3[%c0_5, %c0_6, %c0_7] : memref<1x1x128xf32, #tpu.memory_space<vmem>>, vector<1x1x128xf32>
    %5 = vector.broadcast %4 : vector<1x1x128xf32> to vector<2x16x128xf32>
    %6 = arith.addf %3, %5 : vector<2x16x128xf32>
    %cst = arith.constant 0.000000e+00 : f32
    %7 = vector.broadcast %cst : f32 to vector<2x16x128xf32>
    %8 = arith.maximumf %6, %7 : vector<2x16x128xf32>
    %9 = vector.extract_strided_slice %8 {offsets = [0, 1, 0], sizes = [2, 1, 128], strides = [1, 1, 1]} : vector<2x16x128xf32> to vector<2x1x128xf32>
    %10 = vector.extract_strided_slice %8 {offsets = [0, 0, 0], sizes = [2, 15, 128], strides = [1, 1, 1]} : vector<2x16x128xf32> to vector<2x15x128xf32>
    %11 = tpu.concatenate %9, %10 in 1 : vector<2x1x128xf32>, vector<2x15x128xf32> -> vector<2x16x128xf32>
    %12 = vector.extract_strided_slice %8 {offsets = [0, 1, 0], sizes = [2, 15, 128], strides = [1, 1, 1]} : vector<2x16x128xf32> to vector<2x15x128xf32>
    %13 = vector.extract_strided_slice %8 {offsets = [0, 14, 0], sizes = [2, 1, 128], strides = [1, 1, 1]} : vector<2x16x128xf32> to vector<2x1x128xf32>
    %14 = tpu.concatenate %12, %13 in 1 : vector<2x15x128xf32>, vector<2x1x128xf32> -> vector<2x16x128xf32>
    %15 = tpu.concatenate %11, %8, %14 in 2 : vector<2x16x128xf32>, vector<2x16x128xf32>, vector<2x16x128xf32> -> vector<2x16x384xf32>
    %16 = vector.shape_cast %15 : vector<2x16x384xf32> to vector<32x384xf32>
    %c0_8 = arith.constant 0 : index
    %c0_9 = arith.constant 0 : index
    %17 = vector.load %arg4[%c0_8, %c0_9] : memref<384x128xf32, #tpu.memory_space<vmem>>, vector<384x128xf32>
    %cst_10 = arith.constant dense<0.000000e+00> : vector<32x128xf32>
    %18 = tpu.matmul %16, %17, %cst_10 {dimension_numbers = #tpu.dot_dimension_numbers<[1], [0], [0], [1], [0, 0, 1, 1], [], []>} : vector<32x384xf32>, vector<384x128xf32>, vector<32x128xf32> -> vector<32x128xf32>
    %19 = vector.shape_cast %18 : vector<32x128xf32> to vector<2x16x128xf32>
    %c0_11 = arith.constant 0 : index
    %c0_12 = arith.constant 0 : index
    %c0_13 = arith.constant 0 : index
    %20 = vector.load %arg5[%c0_11, %c0_12, %c0_13] : memref<1x1x128xf32, #tpu.memory_space<vmem>>, vector<1x1x128xf32>
    %21 = vector.broadcast %20 : vector<1x1x128xf32> to vector<2x16x128xf32>
    %22 = arith.addf %19, %21 : vector<2x16x128xf32>
    %cst_14 = arith.constant dense<0.000000e+00> : vector<128xf32>
    %23 = vector.multi_reduction <add>, %22, %cst_14 [0, 1] : vector<2x16x128xf32> to vector<128xf32>
    %24 = vector.shape_cast %23 : vector<128xf32> to vector<1x1x128xf32>
    %c0_15 = arith.constant 0 : index
    %c0_16 = arith.constant 0 : index
    %c0_17 = arith.constant 0 : index
    %25 = vector.load %arg7[%c0_15, %c0_16, %c0_17] : memref<1x1x128xf32, #tpu.memory_space<vmem>>, vector<1x1x128xf32>
    tpu.vector_store %arg7[%c0_15, %c0_16, %c0_17], %24 {strides = array<i32>} : memref<1x1x128xf32, #tpu.memory_space<vmem>>, vector<1x1x128xf32>,
    %26 = arith.mulf %22, %22 : vector<2x16x128xf32>
    %cst_18 = arith.constant dense<0.000000e+00> : vector<128xf32>
    %27 = vector.multi_reduction <add>, %26, %cst_18 [0, 1] : vector<2x16x128xf32> to vector<128xf32>
    %28 = vector.shape_cast %27 : vector<128xf32> to vector<1x1x128xf32>
    %c0_19 = arith.constant 0 : index
    %c0_20 = arith.constant 0 : index
    %c0_21 = arith.constant 0 : index
    %29 = vector.load %arg8[%c0_19, %c0_20, %c0_21] : memref<1x1x128xf32, #tpu.memory_space<vmem>>, vector<1x1x128xf32>
    tpu.vector_store %arg8[%c0_19, %c0_20, %c0_21], %28 {strides = array<i32>} : memref<1x1x128xf32, #tpu.memory_space<vmem>>, vector<1x1x128xf32>,
    %c0_22 = arith.constant 0 : index
    %c0_23 = arith.constant 0 : index
    %c0_24 = arith.constant 0 : index
    %30 = vector.load %arg6[%c0_22, %c0_23, %c0_24] : memref<2x16x128xf32, #tpu.memory_space<vmem>>, vector<2x16x128xf32>
    tpu.vector_store %arg6[%c0_22, %c0_23, %c0_24], %22 {strides = array<i32>} : memref<2x16x128xf32, #tpu.memory_space<vmem>>, vector<2x16x128xf32>,
    return
  }
  func.func @transform_0(%arg0: i32) -> (i32, i32, i32) {
    %c0_i32 = arith.constant 0 : i32
    %c0_i32_0 = arith.constant 0 : i32
    %c0_i32_1 = arith.constant 0 : i32
    return %arg0, %c0_i32, %c0_i32_0 : i32, i32, i32
  }
  func.func @transform_1(%arg0: i32) -> (i32, i32, i32) {
    %c0_i32 = arith.constant 0 : i32
    %c0_i32_0 = arith.constant 0 : i32
    %c0_i32_1 = arith.constant 0 : i32
    %c0_i32_2 = arith.constant 0 : i32
    return %c0_i32, %c0_i32_0, %c0_i32_1 : i32, i32, i32
  }
  func.func @transform_2(%arg0: i32) -> (i32, i32, i32) {
    %c0_i32 = arith.constant 0 : i32
    %c0_i32_0 = arith.constant 0 : i32
    %c0_i32_1 = arith.constant 0 : i32
    %c0_i32_2 = arith.constant 0 : i32
    return %c0_i32, %c0_i32_0, %c0_i32_1 : i32, i32, i32
  }
  func.func @transform_3(%arg0: i32) -> (i32, i32) {
    %c0_i32 = arith.constant 0 : i32
    %c0_i32_0 = arith.constant 0 : i32
    %c0_i32_1 = arith.constant 0 : i32
    return %c0_i32, %c0_i32_0 : i32, i32
  }
  func.func @transform_4(%arg0: i32) -> (i32, i32, i32) {
    %c0_i32 = arith.constant 0 : i32
    %c0_i32_0 = arith.constant 0 : i32
    %c0_i32_1 = arith.constant 0 : i32
    %c0_i32_2 = arith.constant 0 : i32
    return %c0_i32, %c0_i32_0, %c0_i32_1 : i32, i32, i32
  }
  func.func @transform_5(%arg0: i32) -> (i32, i32, i32) {
    %c0_i32 = arith.constant 0 : i32
    %c0_i32_0 = arith.constant 0 : i32
    %c0_i32_1 = arith.constant 0 : i32
    return %arg0, %c0_i32, %c0_i32_0 : i32, i32, i32
  }
  func.func @transform_6(%arg0: i32) -> (i32, i32, i32) {
    %c0_i32 = arith.constant 0 : i32
    %c0_i32_0 = arith.constant 0 : i32
    %c0_i32_1 = arith.constant 0 : i32
    return %arg0, %c0_i32, %c0_i32_0 : i32, i32, i32
  }
  func.func @transform_7(%arg0: i32) -> (i32, i32, i32) {
    %c0_i32 = arith.constant 0 : i32
    %c0_i32_0 = arith.constant 0 : i32
    %c0_i32_1 = arith.constant 0 : i32
    return %arg0, %c0_i32, %c0_i32_0 : i32, i32, i32
  }
}

module attributes {stable_mosaic.version = 11 : i64} {
  func.func @kernel(%arg0: i32, %arg1: memref<2x16x128xf32, #tpu.memory_space<vmem>>, %arg2: memref<1x1x128xf32, #tpu.memory_space<vmem>>, %arg3: memref<1x1x128xf32, #tpu.memory_space<vmem>>, %arg4: memref<2x16x8xf32, #tpu.memory_space<vmem>>) attributes {dimension_semantics = [#tpu.dimension_semantics<parallel>], iteration_bounds = array<i64: 1>, scalar_prefetch = 0 : i64, scratch_operands = 0 : i64, tpu.core_type = #tpu.core_type<tc>, window_params = [{transform_indices = @transform_0, window_bounds = array<i64: 2, 16, 128>}, {pipeline_mode = #tpu.pipeline_mode<synchronous>, transform_indices = @transform_1, window_bounds = array<i64: 1, 1, 128>}, {pipeline_mode = #tpu.pipeline_mode<synchronous>, transform_indices = @transform_2, window_bounds = array<i64: 1, 1, 128>}, {transform_indices = @transform_3, window_bounds = array<i64: 2, 16, 8>}]} {
    %c0 = arith.constant 0 : index
    %c0_0 = arith.constant 0 : index
    %c0_1 = arith.constant 0 : index
    %0 = vector.load %arg1[%c0, %c0_0, %c0_1] : memref<2x16x128xf32, #tpu.memory_space<vmem>>, vector<2x16x128xf32>
    %c0_2 = arith.constant 0 : index
    %c0_3 = arith.constant 0 : index
    %c0_4 = arith.constant 0 : index
    %1 = vector.load %arg2[%c0_2, %c0_3, %c0_4] : memref<1x1x128xf32, #tpu.memory_space<vmem>>, vector<1x1x128xf32>
    %2 = vector.broadcast %1 : vector<1x1x128xf32> to vector<2x16x128xf32>
    %3 = arith.mulf %0, %2 : vector<2x16x128xf32>
    %c0_5 = arith.constant 0 : index
    %c0_6 = arith.constant 0 : index
    %c0_7 = arith.constant 0 : index
    %4 = vector.load %arg3[%c0_5, %c0_6, %c0_7] : memref<1x1x128xf32, #tpu.memory_space<vmem>>, vector<1x1x128xf32>
    %5 = vector.broadcast %4 : vector<1x1x128xf32> to vector<2x16x128xf32>
    %6 = arith.addf %3, %5 : vector<2x16x128xf32>
    %cst = arith.constant 0.000000e+00 : f32
    %7 = vector.broadcast %cst : f32 to vector<2x16x128xf32>
    %8 = arith.maximumf %6, %7 : vector<2x16x128xf32>
    %9 = vector.extract_strided_slice %8 {offsets = [0, 0, 0], sizes = [2, 16, 8], strides = [1, 1, 1]} : vector<2x16x128xf32> to vector<2x16x8xf32>
    %c0_8 = arith.constant 0 : index
    %c0_9 = arith.constant 0 : index
    %c0_10 = arith.constant 0 : index
    %10 = vector.load %arg4[%c0_8, %c0_9, %c0_10] : memref<2x16x8xf32, #tpu.memory_space<vmem>>, vector<2x16x8xf32>
    tpu.vector_store %arg4[%c0_8, %c0_9, %c0_10], %9 {strides = array<i32>} : memref<2x16x8xf32, #tpu.memory_space<vmem>>, vector<2x16x8xf32>,
    return
  }
  func.func @transform_0(%arg0: i32) -> (i32, i32, i32) {
    %c0_i32 = arith.constant 0 : i32
    %c0_i32_0 = arith.constant 0 : i32
    %c0_i32_1 = arith.constant 0 : i32
    return %arg0, %c0_i32, %c0_i32_0 : i32, i32, i32
  }
  func.func @transform_1(%arg0: i32) -> (i32, i32, i32) {
    %c0_i32 = arith.constant 0 : i32
    %c0_i32_0 = arith.constant 0 : i32
    %c0_i32_1 = arith.constant 0 : i32
    %c0_i32_2 = arith.constant 0 : i32
    return %c0_i32, %c0_i32_0, %c0_i32_1 : i32, i32, i32
  }
  func.func @transform_2(%arg0: i32) -> (i32, i32, i32) {
    %c0_i32 = arith.constant 0 : i32
    %c0_i32_0 = arith.constant 0 : i32
    %c0_i32_1 = arith.constant 0 : i32
    %c0_i32_2 = arith.constant 0 : i32
    return %c0_i32, %c0_i32_0, %c0_i32_1 : i32, i32, i32
  }
  func.func @transform_3(%arg0: i32) -> (i32, i32, i32) {
    %c0_i32 = arith.constant 0 : i32
    %c0_i32_0 = arith.constant 0 : i32
    %c0_i32_1 = arith.constant 0 : i32
    return %arg0, %c0_i32, %c0_i32_0 : i32, i32, i32
  }
}

module attributes {stable_mosaic.version = 11 : i64} {
  func.func @kernel(%arg0: i32, %arg1: memref<2x16x128xf32, #tpu.memory_space<vmem>>, %arg2: memref<1x1x128xf32, #tpu.memory_space<vmem>>, %arg3: memref<1x1x128xf32, #tpu.memory_space<vmem>>, %arg4: memref<384x128xf32, #tpu.memory_space<vmem>>, %arg5: memref<1x1x128xf32, #tpu.memory_space<vmem>>, %arg6: memref<2x16x128xf32, #tpu.memory_space<vmem>>, %arg7: memref<2x16x128xf32, #tpu.memory_space<vmem>>, %arg8: memref<1x1x128xf32, #tpu.memory_space<vmem>>, %arg9: memref<1x1x128xf32, #tpu.memory_space<vmem>>) attributes {dimension_semantics = [#tpu.dimension_semantics<parallel>], iteration_bounds = array<i64: 1>, scalar_prefetch = 0 : i64, scratch_operands = 0 : i64, tpu.core_type = #tpu.core_type<tc>, window_params = [{transform_indices = @transform_0, window_bounds = array<i64: 2, 16, 128>}, {pipeline_mode = #tpu.pipeline_mode<synchronous>, transform_indices = @transform_1, window_bounds = array<i64: 1, 1, 128>}, {pipeline_mode = #tpu.pipeline_mode<synchronous>, transform_indices = @transform_2, window_bounds = array<i64: 1, 1, 128>}, {pipeline_mode = #tpu.pipeline_mode<synchronous>, transform_indices = @transform_3, window_bounds = array<i64: 384, 128>}, {pipeline_mode = #tpu.pipeline_mode<synchronous>, transform_indices = @transform_4, window_bounds = array<i64: 1, 1, 128>}, {transform_indices = @transform_5, window_bounds = array<i64: 2, 16, 128>}, {transform_indices = @transform_6, window_bounds = array<i64: 2, 16, 128>}, {transform_indices = @transform_7, window_bounds = array<i64: 1, 1, 128>}, {transform_indices = @transform_8, window_bounds = array<i64: 1, 1, 128>}]} {
    %c0 = arith.constant 0 : index
    %c0_0 = arith.constant 0 : index
    %c0_1 = arith.constant 0 : index
    %0 = vector.load %arg1[%c0, %c0_0, %c0_1] : memref<2x16x128xf32, #tpu.memory_space<vmem>>, vector<2x16x128xf32>
    %c0_2 = arith.constant 0 : index
    %c0_3 = arith.constant 0 : index
    %c0_4 = arith.constant 0 : index
    %1 = vector.load %arg2[%c0_2, %c0_3, %c0_4] : memref<1x1x128xf32, #tpu.memory_space<vmem>>, vector<1x1x128xf32>
    %2 = vector.broadcast %1 : vector<1x1x128xf32> to vector<2x16x128xf32>
    %3 = arith.mulf %0, %2 : vector<2x16x128xf32>
    %c0_5 = arith.constant 0 : index
    %c0_6 = arith.constant 0 : index
    %c0_7 = arith.constant 0 : index
    %4 = vector.load %arg3[%c0_5, %c0_6, %c0_7] : memref<1x1x128xf32, #tpu.memory_space<vmem>>, vector<1x1x128xf32>
    %5 = vector.broadcast %4 : vector<1x1x128xf32> to vector<2x16x128xf32>
    %6 = arith.addf %3, %5 : vector<2x16x128xf32>
    %cst = arith.constant 0.000000e+00 : f32
    %7 = vector.broadcast %cst : f32 to vector<2x16x128xf32>
    %8 = arith.maximumf %6, %7 : vector<2x16x128xf32>
    %9 = vector.extract_strided_slice %8 {offsets = [0, 1, 0], sizes = [2, 1, 128], strides = [1, 1, 1]} : vector<2x16x128xf32> to vector<2x1x128xf32>
    %10 = vector.extract_strided_slice %8 {offsets = [0, 0, 0], sizes = [2, 15, 128], strides = [1, 1, 1]} : vector<2x16x128xf32> to vector<2x15x128xf32>
    %11 = tpu.concatenate %9, %10 in 1 : vector<2x1x128xf32>, vector<2x15x128xf32> -> vector<2x16x128xf32>
    %12 = vector.extract_strided_slice %8 {offsets = [0, 1, 0], sizes = [2, 15, 128], strides = [1, 1, 1]} : vector<2x16x128xf32> to vector<2x15x128xf32>
    %13 = vector.extract_strided_slice %8 {offsets = [0, 14, 0], sizes = [2, 1, 128], strides = [1, 1, 1]} : vector<2x16x128xf32> to vector<2x1x128xf32>
    %14 = tpu.concatenate %12, %13 in 1 : vector<2x15x128xf32>, vector<2x1x128xf32> -> vector<2x16x128xf32>
    %15 = tpu.concatenate %11, %8, %14 in 2 : vector<2x16x128xf32>, vector<2x16x128xf32>, vector<2x16x128xf32> -> vector<2x16x384xf32>
    %16 = vector.shape_cast %15 : vector<2x16x384xf32> to vector<32x384xf32>
    %c0_8 = arith.constant 0 : index
    %c0_9 = arith.constant 0 : index
    %17 = vector.load %arg4[%c0_8, %c0_9] : memref<384x128xf32, #tpu.memory_space<vmem>>, vector<384x128xf32>
    %cst_10 = arith.constant dense<0.000000e+00> : vector<32x128xf32>
    %18 = tpu.matmul %16, %17, %cst_10 {dimension_numbers = #tpu.dot_dimension_numbers<[1], [0], [0], [1], [0, 0, 1, 1], [], []>} : vector<32x384xf32>, vector<384x128xf32>, vector<32x128xf32> -> vector<32x128xf32>
    %19 = vector.shape_cast %18 : vector<32x128xf32> to vector<2x16x128xf32>
    %c0_11 = arith.constant 0 : index
    %c0_12 = arith.constant 0 : index
    %c0_13 = arith.constant 0 : index
    %20 = vector.load %arg5[%c0_11, %c0_12, %c0_13] : memref<1x1x128xf32, #tpu.memory_space<vmem>>, vector<1x1x128xf32>
    %21 = vector.broadcast %20 : vector<1x1x128xf32> to vector<2x16x128xf32>
    %22 = arith.addf %19, %21 : vector<2x16x128xf32>
    %c0_14 = arith.constant 0 : index
    %c0_15 = arith.constant 0 : index
    %c0_16 = arith.constant 0 : index
    %23 = vector.load %arg6[%c0_14, %c0_15, %c0_16] : memref<2x16x128xf32, #tpu.memory_space<vmem>>, vector<2x16x128xf32>
    %24 = arith.addf %22, %23 : vector<2x16x128xf32>
    %cst_17 = arith.constant dense<0.000000e+00> : vector<128xf32>
    %25 = vector.multi_reduction <add>, %24, %cst_17 [0, 1] : vector<2x16x128xf32> to vector<128xf32>
    %26 = vector.shape_cast %25 : vector<128xf32> to vector<1x1x128xf32>
    %c0_18 = arith.constant 0 : index
    %c0_19 = arith.constant 0 : index
    %c0_20 = arith.constant 0 : index
    %27 = vector.load %arg8[%c0_18, %c0_19, %c0_20] : memref<1x1x128xf32, #tpu.memory_space<vmem>>, vector<1x1x128xf32>
    tpu.vector_store %arg8[%c0_18, %c0_19, %c0_20], %26 {strides = array<i32>} : memref<1x1x128xf32, #tpu.memory_space<vmem>>, vector<1x1x128xf32>,
    %28 = arith.mulf %24, %24 : vector<2x16x128xf32>
    %cst_21 = arith.constant dense<0.000000e+00> : vector<128xf32>
    %29 = vector.multi_reduction <add>, %28, %cst_21 [0, 1] : vector<2x16x128xf32> to vector<128xf32>
    %30 = vector.shape_cast %29 : vector<128xf32> to vector<1x1x128xf32>
    %c0_22 = arith.constant 0 : index
    %c0_23 = arith.constant 0 : index
    %c0_24 = arith.constant 0 : index
    %31 = vector.load %arg9[%c0_22, %c0_23, %c0_24] : memref<1x1x128xf32, #tpu.memory_space<vmem>>, vector<1x1x128xf32>
    tpu.vector_store %arg9[%c0_22, %c0_23, %c0_24], %30 {strides = array<i32>} : memref<1x1x128xf32, #tpu.memory_space<vmem>>, vector<1x1x128xf32>,
    %c0_25 = arith.constant 0 : index
    %c0_26 = arith.constant 0 : index
    %c0_27 = arith.constant 0 : index
    %32 = vector.load %arg7[%c0_25, %c0_26, %c0_27] : memref<2x16x128xf32, #tpu.memory_space<vmem>>, vector<2x16x128xf32>
    tpu.vector_store %arg7[%c0_25, %c0_26, %c0_27], %24 {strides = array<i32>} : memref<2x16x128xf32, #tpu.memory_space<vmem>>, vector<2x16x128xf32>,
    return
  }
  func.func @transform_0(%arg0: i32) -> (i32, i32, i32) {
    %c0_i32 = arith.constant 0 : i32
    %c0_i32_0 = arith.constant 0 : i32
    %c0_i32_1 = arith.constant 0 : i32
    return %arg0, %c0_i32, %c0_i32_0 : i32, i32, i32
  }
  func.func @transform_1(%arg0: i32) -> (i32, i32, i32) {
    %c0_i32 = arith.constant 0 : i32
    %c0_i32_0 = arith.constant 0 : i32
    %c0_i32_1 = arith.constant 0 : i32
    %c0_i32_2 = arith.constant 0 : i32
    return %c0_i32, %c0_i32_0, %c0_i32_1 : i32, i32, i32
  }
  func.func @transform_2(%arg0: i32) -> (i32, i32, i32) {
    %c0_i32 = arith.constant 0 : i32
    %c0_i32_0 = arith.constant 0 : i32
    %c0_i32_1 = arith.constant 0 : i32
    %c0_i32_2 = arith.constant 0 : i32
    return %c0_i32, %c0_i32_0, %c0_i32_1 : i32, i32, i32
  }
  func.func @transform_3(%arg0: i32) -> (i32, i32) {
    %c0_i32 = arith.constant 0 : i32
    %c0_i32_0 = arith.constant 0 : i32
    %c0_i32_1 = arith.constant 0 : i32
    return %c0_i32, %c0_i32_0 : i32, i32
  }
  func.func @transform_4(%arg0: i32) -> (i32, i32, i32) {
    %c0_i32 = arith.constant 0 : i32
    %c0_i32_0 = arith.constant 0 : i32
    %c0_i32_1 = arith.constant 0 : i32
    %c0_i32_2 = arith.constant 0 : i32
    return %c0_i32, %c0_i32_0, %c0_i32_1 : i32, i32, i32
  }
  func.func @transform_5(%arg0: i32) -> (i32, i32, i32) {
    %c0_i32 = arith.constant 0 : i32
    %c0_i32_0 = arith.constant 0 : i32
    %c0_i32_1 = arith.constant 0 : i32
    return %arg0, %c0_i32, %c0_i32_0 : i32, i32, i32
  }
  func.func @transform_6(%arg0: i32) -> (i32, i32, i32) {
    %c0_i32 = arith.constant 0 : i32
    %c0_i32_0 = arith.constant 0 : i32
    %c0_i32_1 = arith.constant 0 : i32
    return %arg0, %c0_i32, %c0_i32_0 : i32, i32, i32
  }
  func.func @transform_7(%arg0: i32) -> (i32, i32, i32) {
    %c0_i32 = arith.constant 0 : i32
    %c0_i32_0 = arith.constant 0 : i32
    %c0_i32_1 = arith.constant 0 : i32
    return %arg0, %c0_i32, %c0_i32_0 : i32, i32, i32
  }
  func.func @transform_8(%arg0: i32) -> (i32, i32, i32) {
    %c0_i32 = arith.constant 0 : i32
    %c0_i32_0 = arith.constant 0 : i32
    %c0_i32_1 = arith.constant 0 : i32
    return %arg0, %c0_i32, %c0_i32_0 : i32, i32, i32
  }
}

module attributes {stable_mosaic.version = 11 : i64} {
  func.func @kernel(%arg0: i32, %arg1: memref<2x16x128xf32, #tpu.memory_space<vmem>>, %arg2: memref<384x128xf32, #tpu.memory_space<vmem>>, %arg3: memref<1x1x128xf32, #tpu.memory_space<vmem>>, %arg4: memref<2x16x128xf32, #tpu.memory_space<vmem>>, %arg5: memref<1x1x128xf32, #tpu.memory_space<vmem>>, %arg6: memref<1x1x128xf32, #tpu.memory_space<vmem>>) attributes {dimension_semantics = [#tpu.dimension_semantics<parallel>], iteration_bounds = array<i64: 1>, scalar_prefetch = 0 : i64, scratch_operands = 0 : i64, tpu.core_type = #tpu.core_type<tc>, window_params = [{transform_indices = @transform_0, window_bounds = array<i64: 2, 16, 128>}, {pipeline_mode = #tpu.pipeline_mode<synchronous>, transform_indices = @transform_1, window_bounds = array<i64: 384, 128>}, {pipeline_mode = #tpu.pipeline_mode<synchronous>, transform_indices = @transform_2, window_bounds = array<i64: 1, 1, 128>}, {transform_indices = @transform_3, window_bounds = array<i64: 2, 16, 128>}, {transform_indices = @transform_4, window_bounds = array<i64: 1, 1, 128>}, {transform_indices = @transform_5, window_bounds = array<i64: 1, 1, 128>}]} {
    %c0 = arith.constant 0 : index
    %c0_0 = arith.constant 0 : index
    %c0_1 = arith.constant 0 : index
    %0 = vector.load %arg1[%c0, %c0_0, %c0_1] : memref<2x16x128xf32, #tpu.memory_space<vmem>>, vector<2x16x128xf32>
    %1 = vector.extract_strided_slice %0 {offsets = [0, 1, 0], sizes = [2, 1, 128], strides = [1, 1, 1]} : vector<2x16x128xf32> to vector<2x1x128xf32>
    %2 = vector.extract_strided_slice %0 {offsets = [0, 0, 0], sizes = [2, 15, 128], strides = [1, 1, 1]} : vector<2x16x128xf32> to vector<2x15x128xf32>
    %3 = tpu.concatenate %1, %2 in 1 : vector<2x1x128xf32>, vector<2x15x128xf32> -> vector<2x16x128xf32>
    %4 = vector.extract_strided_slice %0 {offsets = [0, 1, 0], sizes = [2, 15, 128], strides = [1, 1, 1]} : vector<2x16x128xf32> to vector<2x15x128xf32>
    %5 = vector.extract_strided_slice %0 {offsets = [0, 14, 0], sizes = [2, 1, 128], strides = [1, 1, 1]} : vector<2x16x128xf32> to vector<2x1x128xf32>
    %6 = tpu.concatenate %4, %5 in 1 : vector<2x15x128xf32>, vector<2x1x128xf32> -> vector<2x16x128xf32>
    %7 = tpu.concatenate %3, %0, %6 in 2 : vector<2x16x128xf32>, vector<2x16x128xf32>, vector<2x16x128xf32> -> vector<2x16x384xf32>
    %8 = vector.shape_cast %7 : vector<2x16x384xf32> to vector<32x384xf32>
    %c0_2 = arith.constant 0 : index
    %c0_3 = arith.constant 0 : index
    %9 = vector.load %arg2[%c0_2, %c0_3] : memref<384x128xf32, #tpu.memory_space<vmem>>, vector<384x128xf32>
    %cst = arith.constant dense<0.000000e+00> : vector<32x128xf32>
    %10 = tpu.matmul %8, %9, %cst {dimension_numbers = #tpu.dot_dimension_numbers<[1], [0], [0], [1], [0, 0, 1, 1], [], []>} : vector<32x384xf32>, vector<384x128xf32>, vector<32x128xf32> -> vector<32x128xf32>
    %11 = vector.shape_cast %10 : vector<32x128xf32> to vector<2x16x128xf32>
    %c0_4 = arith.constant 0 : index
    %c0_5 = arith.constant 0 : index
    %c0_6 = arith.constant 0 : index
    %12 = vector.load %arg3[%c0_4, %c0_5, %c0_6] : memref<1x1x128xf32, #tpu.memory_space<vmem>>, vector<1x1x128xf32>
    %13 = vector.broadcast %12 : vector<1x1x128xf32> to vector<2x16x128xf32>
    %14 = arith.addf %11, %13 : vector<2x16x128xf32>
    %cst_7 = arith.constant dense<0.000000e+00> : vector<128xf32>
    %15 = vector.multi_reduction <add>, %14, %cst_7 [0, 1] : vector<2x16x128xf32> to vector<128xf32>
    %16 = vector.shape_cast %15 : vector<128xf32> to vector<1x1x128xf32>
    %c0_8 = arith.constant 0 : index
    %c0_9 = arith.constant 0 : index
    %c0_10 = arith.constant 0 : index
    %17 = vector.load %arg5[%c0_8, %c0_9, %c0_10] : memref<1x1x128xf32, #tpu.memory_space<vmem>>, vector<1x1x128xf32>
    tpu.vector_store %arg5[%c0_8, %c0_9, %c0_10], %16 {strides = array<i32>} : memref<1x1x128xf32, #tpu.memory_space<vmem>>, vector<1x1x128xf32>,
    %18 = arith.mulf %14, %14 : vector<2x16x128xf32>
    %cst_11 = arith.constant dense<0.000000e+00> : vector<128xf32>
    %19 = vector.multi_reduction <add>, %18, %cst_11 [0, 1] : vector<2x16x128xf32> to vector<128xf32>
    %20 = vector.shape_cast %19 : vector<128xf32> to vector<1x1x128xf32>
    %c0_12 = arith.constant 0 : index
    %c0_13 = arith.constant 0 : index
    %c0_14 = arith.constant 0 : index
    %21 = vector.load %arg6[%c0_12, %c0_13, %c0_14] : memref<1x1x128xf32, #tpu.memory_space<vmem>>, vector<1x1x128xf32>
    tpu.vector_store %arg6[%c0_12, %c0_13, %c0_14], %20 {strides = array<i32>} : memref<1x1x128xf32, #tpu.memory_space<vmem>>, vector<1x1x128xf32>,
    %c0_15 = arith.constant 0 : index
    %c0_16 = arith.constant 0 : index
    %c0_17 = arith.constant 0 : index
    %22 = vector.load %arg4[%c0_15, %c0_16, %c0_17] : memref<2x16x128xf32, #tpu.memory_space<vmem>>, vector<2x16x128xf32>
    tpu.vector_store %arg4[%c0_15, %c0_16, %c0_17], %14 {strides = array<i32>} : memref<2x16x128xf32, #tpu.memory_space<vmem>>, vector<2x16x128xf32>,
    return
  }
  func.func @transform_0(%arg0: i32) -> (i32, i32, i32) {
    %c0_i32 = arith.constant 0 : i32
    %c0_i32_0 = arith.constant 0 : i32
    %c0_i32_1 = arith.constant 0 : i32
    return %arg0, %c0_i32, %c0_i32_0 : i32, i32, i32
  }
  func.func @transform_1(%arg0: i32) -> (i32, i32) {
    %c0_i32 = arith.constant 0 : i32
    %c0_i32_0 = arith.constant 0 : i32
    %c0_i32_1 = arith.constant 0 : i32
    return %c0_i32, %c0_i32_0 : i32, i32
  }
  func.func @transform_2(%arg0: i32) -> (i32, i32, i32) {
    %c0_i32 = arith.constant 0 : i32
    %c0_i32_0 = arith.constant 0 : i32
    %c0_i32_1 = arith.constant 0 : i32
    %c0_i32_2 = arith.constant 0 : i32
    return %c0_i32, %c0_i32_0, %c0_i32_1 : i32, i32, i32
  }
  func.func @transform_3(%arg0: i32) -> (i32, i32, i32) {
    %c0_i32 = arith.constant 0 : i32
    %c0_i32_0 = arith.constant 0 : i32
    %c0_i32_1 = arith.constant 0 : i32
    return %arg0, %c0_i32, %c0_i32_0 : i32, i32, i32
  }
  func.func @transform_4(%arg0: i32) -> (i32, i32, i32) {
    %c0_i32 = arith.constant 0 : i32
    %c0_i32_0 = arith.constant 0 : i32
    %c0_i32_1 = arith.constant 0 : i32
    return %arg0, %c0_i32, %c0_i32_0 : i32, i32, i32
  }
  func.func @transform_5(%arg0: i32) -> (i32, i32, i32) {
    %c0_i32 = arith.constant 0 : i32
    %c0_i32_0 = arith.constant 0 : i32
    %c0_i32_1 = arith.constant 0 : i32
    return %arg0, %c0_i32, %c0_i32_0 : i32, i32, i32
  }
}

</mosaic_0001>

<bundles_post_ra>
// kernel: _lambda_.7
= control target key start
LH: loop header
LB: loop body
LE: loop exit
PB: predicated region body
PF: predicated region fallthrough
CT: control target
= control target key end

     0   :  { %vm38_vm0 = vcmask 64512   ;;  %s99_s0 = inlined_call_operand.vmem [shape: f32[2,16,128], index: 0, kind: input, shape index: {}]   ;;  %s100_s1 = inlined_call_operand.vmem [shape: f32[1,1,128], index: 1, kind: input, shape index: {}]   ;;  %s101_s2 = inlined_call_operand.vmem [shape: f32[1,1,128], index: 2, kind: input, shape index: {}]   ;;  %s102_s3 = inlined_call_operand.vmem [shape: f32[2,16,8], index: 3, kind: output, shape index: {}]  }
   0x1   :  { %v14_v0 = vld [vmem:[%s99_s0] sm:$0xff]  ;;  %v15_v3 = vld [vmem:[%s99_s0 + $0x8] sm:$0xff]  ;;  %v16_v6 = vld [vmem:[%s99_s0 + $0x10] sm:$0xff] }
   0x2   :  { %v47_v1 = vld [vmem:[%s100_s1] ss:$0 sm:$0xff]  ;;  %v17_v7 = vld [vmem:[%s99_s0 + $0x18] sm:$0xff] }
   0x3   :  { %v48_v2 = vld [vmem:[%s101_s2] ss:$0 sm:$0xff]  ;;  %v22_v4 = vmul.f32 %v47_v1, %v14_v0  ;;  %v23_v5 = vmul.f32 %v47_v1, %v15_v3  ;;  %v24_v8 = vmul.f32 %v47_v1, %v16_v6  ;;  %v25_v9 = vmul.f32 %v47_v1, %v17_v7 }
   0x5   :  { %v30_v10 = vadd.f32 %v48_v2, %v22_v4  ;;  %v31_v11 = vadd.f32 %v48_v2, %v23_v5  ;;  %v32_v12 = vadd.f32 %v48_v2, %v24_v8  ;;  %v33_v13 = vadd.f32 %v48_v2, %v25_v9 }
   0x7   :  { %v34_v14 = vmax.f32 %v30_v10, 0.0  ;;  %v35_v15 = vmax.f32 %v31_v11, 0.0  ;;  %v36_v16 = vmax.f32 %v32_v12, 0.0  ;;  %v37_v17 = vmax.f32 %v33_v13, 0.0 }
   0x9   :  { %39 = vst.msk [vmem:[%s102_s3] sm:$0xff] %vm38_vm0, %v34_v14 }
   0xa   :  { %40 = vst.msk [vmem:[%s102_s3 + $0x8] sm:$0xff] %vm38_vm0, %v35_v15 }
   0xb   :  { %41 = vst.msk [vmem:[%s102_s3 + $0x10] sm:$0xff] %vm38_vm0, %v36_v16 }
   0xc   :  { %42 = vst.msk [vmem:[%s102_s3 + $0x18] sm:$0xff] %vm38_vm0, %v37_v17 }

// kernel: _lambda_.5
= control target key start
LH: loop header
LB: loop body
LE: loop exit
PB: predicated region body
PF: predicated region fallthrough
CT: control target
= control target key end

     0   :  { %vm68_vm0 = vcmask 1046528   ;;  %vm55_vm1 = vcmask 1040384   ;;  %s531_s3 = inlined_call_operand.vmem [shape: f32[384,128], index: 3, kind: input, shape index: {}]   ;;  %s532_s0 = inlined_call_operand.vmem [shape: f32[2,16,128], index: 0, kind: input, shape index: {}]   ;;  %s533_s1 = inlined_call_operand.vmem [shape: f32[1,1,128], index: 1, kind: input, shape index: {}]   ;;  %s534_s2 = inlined_call_operand.vmem [shape: f32[1,1,128], index: 2, kind: input, shape index: {}]   ;;  %s535_s4 = inlined_call_operand.vmem [shape: f32[1,1,128], index: 4, kind: input, shape index: {}]   ;;  %s536_s5 = inlined_call_operand.vmem [shape: f32[2,16,128], index: 5, kind: output, shape index: {0}]   ;;  %s537_s6 = inlined_call_operand.vmem [shape: f32[1,1,128], index: 6, kind: output, shape index: {1}]   ;;  %s538_s7 = inlined_call_operand.vmem [shape: f32[1,1,128], index: 7, kind: output, shape index: {2}]  }
   0x1   :  { %v128_v0 = vld [vmem:[%s531_s3 + $0x178] sm:$0xff]  ;;  %v127_v1 = vld [vmem:[%s531_s3 + $0x170] sm:$0xff]  ;;  %v126_v5 = vld [vmem:[%s531_s3 + $0x168] sm:$0xff] }
   0x2   :  { %v96_v2 = vld [vmem:[%s531_s3 + $0x78] sm:$0xff]  ;;  %187 = vmatpush.msra.mxu2 %v128_v0  ;;  %v95_v4 = vld [vmem:[%s531_s3 + $0x70] sm:$0xff]  ;;  %v94_v7 = vld [vmem:[%s531_s3 + $0x68] sm:$0xff] }
   0x3   :  { %129 = vmatpush.msra.mxu0 %v96_v2  ;;  %v112_v3 = vld [vmem:[%s531_s3 + $0xf8] sm:$0xff]  ;;  %264 = vmatpush.msra.mxu3 %v96_v2  ;;  %v111_v6 = vld [vmem:[%s531_s3 + $0xf0] sm:$0xff]  ;;  %v110_v8 = vld [vmem:[%s531_s3 + $0xe8] sm:$0xff] }
   0x4   :  { %158 = vmatpush.msra.mxu1 %v112_v3  ;;  %188 = vmatpush.msra.mxu2 %v127_v1  ;;  %v125_v9 = vld [vmem:[%s531_s3 + $0x160] sm:$0xff]  ;;  %v124_v12 = vld [vmem:[%s531_s3 + $0x158] sm:$0xff]  ;;  %v123_v15 = vld [vmem:[%s531_s3 + $0x150] sm:$0xff] }
   0x5   :  { %130 = vmatpush.msra.mxu0 %v95_v4  ;;  %265 = vmatpush.msra.mxu3 %v95_v4  ;;  %v93_v10 = vld [vmem:[%s531_s3 + $0x60] sm:$0xff]  ;;  %v92_v13 = vld [vmem:[%s531_s3 + $0x58] sm:$0xff]  ;;  %v91_v16 = vld [vmem:[%s531_s3 + $0x50] sm:$0xff] }
   0x6   :  { %159 = vmatpush.msra.mxu1 %v111_v6  ;;  %189 = vmatpush.msra.mxu2 %v126_v5  ;;  %v109_v11 = vld [vmem:[%s531_s3 + $0xe0] sm:$0xff]  ;;  %v108_v14 = vld [vmem:[%s531_s3 + $0xd8] sm:$0xff]  ;;  %v107_v17 = vld [vmem:[%s531_s3 + $0xd0] sm:$0xff] }
   0x7   :  { %131 = vmatpush.msra.mxu0 %v94_v7  ;;  %266 = vmatpush.msra.mxu3 %v94_v7  ;;  %v122_v18 = vld [vmem:[%s531_s3 + $0x148] sm:$0xff]  ;;  %v121_v21 = vld [vmem:[%s531_s3 + $0x140] sm:$0xff]  ;;  %v120_v23 = vld [vmem:[%s531_s3 + $0x138] sm:$0xff] }
   0x8   :  { %160 = vmatpush.msra.mxu1 %v110_v8  ;;  %190 = vmatpush.msra.mxu2 %v125_v9  ;;  %v90_v19 = vld [vmem:[%s531_s3 + $0x48] sm:$0xff]  ;;  %v89_v22 = vld [vmem:[%s531_s3 + $0x40] sm:$0xff]  ;;  %v119_v25 = vld [vmem:[%s531_s3 + $0x130] sm:$0xff] }
   0x9   :  { %132 = vmatpush.msra.mxu0 %v93_v10  ;;  %267 = vmatpush.msra.mxu3 %v93_v10  ;;  %v106_v20 = vld [vmem:[%s531_s3 + $0xc8] sm:$0xff]  ;;  %v105_v24 = vld [vmem:[%s531_s3 + $0xc0] sm:$0xff]  ;;  %v88_v26 = vld [vmem:[%s531_s3 + $0x38] sm:$0xff] }
   0xa   :  { %161 = vmatpush.msra.mxu1 %v109_v11  ;;  %191 = vmatpush.msra.mxu2 %v124_v12  ;;  %v104_v27 = vld [vmem:[%s531_s3 + $0xb8] sm:$0xff]  ;;  %v23_v28 = vld [vmem:[%s532_s0] sm:$0xff]  ;;  %v24_v29 = vld [vmem:[%s532_s0 + $0x8] sm:$0xff] }
   0xb   :  { %133 = vmatpush.msra.mxu0 %v92_v13  ;;  %268 = vmatpush.msra.mxu3 %v92_v13  ;;  %v416_v30 = vld [vmem:[%s533_s1] ss:$0 sm:$0xff]  ;;  %v87_v31 = vld [vmem:[%s531_s3 + $0x30] sm:$0xff]  ;;  %v118_v36 = vld [vmem:[%s531_s3 + $0x128] sm:$0xff] }
   0xc   :  { %162 = vmatpush.msra.mxu1 %v108_v14  ;;  %192 = vmatpush.msra.mxu2 %v123_v15  ;;  %v424_v32 = vld [vmem:[%s534_s2] ss:$0 sm:$0xff]  ;;  %v103_v33 = vld [vmem:[%s531_s3 + $0xb0] sm:$0xff]  ;;  %v31_v34 = vmul.f32 %v416_v30, %v23_v28  ;;  %v32_v35 = vmul.f32 %v416_v30, %v24_v29  ;;  %v86_v37 = vld [vmem:[%s531_s3 + $0x28] sm:$0xff] }
   0xd   :  { %134 = vmatpush.msra.mxu0 %v91_v16  ;;  %269 = vmatpush.msra.mxu3 %v91_v16  ;;  %v102_v38 = vld [vmem:[%s531_s3 + $0xa8] sm:$0xff]  ;;  %v117_v41 = vld [vmem:[%s531_s3 + $0x120] sm:$0xff]  ;;  %v25_v46 = vld [vmem:[%s532_s0 + $0x10] sm:$0xff] }
   0xe   :  { %163 = vmatpush.msra.mxu1 %v107_v17  ;;  %193 = vmatpush.msra.mxu2 %v122_v18  ;;  %v39_v39 = vadd.f32 %v424_v32, %v31_v34  ;;  %v40_v40 = vadd.f32 %v424_v32, %v32_v35  ;;  %v85_v42 = vld [vmem:[%s531_s3 + $0x20] sm:$0xff]  ;;  %v116_v47 = vld [vmem:[%s531_s3 + $0x118] sm:$0xff]  ;;  %v115_v50 = vld [vmem:[%s531_s3 + $0x110] sm:$0xff]  ;;  %v33_v52 = vmul.f32 %v416_v30, %v25_v46 }
   0xf   :  { %135 = vmatpush.msra.mxu0 %v90_v19  ;;  %270 = vmatpush.msra.mxu3 %v90_v19  ;;  %v101_v43 = vld [vmem:[%s531_s3 + $0xa0] sm:$0xff]  ;;  %v84_v48 = vld [vmem:[%s531_s3 + $0x18] sm:$0xff]  ;;  %v83_v51 = vld [vmem:[%s531_s3 + $0x10] sm:$0xff] }
  0x10   :  { %164 = vmatpush.msra.mxu1 %v106_v20  ;;  %194 = vmatpush.msra.mxu2 %v121_v21  ;;  %v43_v44 = vmax.f32 %v39_v39, 0.0  ;;  %v451_v45 = vmax.f32 %v40_v40, 0.0  ;;  %v100_v49 = vld [vmem:[%s531_s3 + $0x98] sm:$0xff]  ;;  %v99_v53 = vld [vmem:[%s531_s3 + $0x90] sm:$0xff]  ;;  %v114_v56 = vld [vmem:[%s531_s3 + $0x108] sm:$0xff]  ;;  %v41_v0 = vadd.f32 %v424_v32, %v33_v52 }
  0x11   :  { %136 = vmatpush.msra.mxu0 %v89_v22  ;;  %271 = vmatpush.msra.mxu3 %v89_v22  ;;  %v82_v57 = vld [vmem:[%s531_s3 + $0x8] sm:$0xff]  ;;  %v26_v59 = vld [vmem:[%s532_s0 + $0x18] sm:$0xff]  ;;  %v113_v61 = vld [vmem:[%s531_s3 + $0x100] sm:$0xff] }
  0x12   :  { %165 = vmatpush.msra.mxu1 %v105_v24  ;;  %195 = vmatpush.msra.mxu2 %v120_v23  ;;  %v49_v54 = vrot.slane %v43_v44, 1  ;;  %v69_v55 = vrot.slane %v451_v45, 1  ;;  %v56_v58 = vrot.slane %v43_v44, 7  ;;  %v98_v60 = vld [vmem:[%s531_s3 + $0x88] sm:$0xff]  ;;  %v81_v62 = vld [vmem:[%s531_s3] sm:$0xff]  ;;  %v57_v63 = vrot.slane %v451_v45, 7 }
  0x13   :  { %137 = vmatpush.msra.mxu0 %v88_v26  ;;  %272 = vmatpush.msra.mxu3 %v88_v26  ;;  %v97_v2 = vld [vmem:[%s531_s3 + $0x80] sm:$0xff]  ;;  %v34_v3 = vmul.f32 %v416_v30, %v26_v59  ;;  %v45_v6 = vmax.f32 %v41_v0, 0.0 }
  0x14   :  { %166 = vmatpush.msra.mxu1 %v104_v27  ;;  %196 = vmatpush.msra.mxu2 %v119_v25  ;;  %v70_v1 = vsel %vm68_vm0, %v49_v54, %v69_v55  ;;  %v66_v4 = vsel %vm55_vm1, %v49_v54, %v56_v58  ;;  %v58_v5 = vsel %vm55_vm1, %v56_v58, %v57_v63  ;;  %v282_v21 = vld [vmem:[%s535_s4] ss:$0 sm:$0xff] }
  0x15   :  { %138 = vmatpush.msra.mxu0 %v87_v31  ;;  %273 = vmatpush.msra.mxu3 %v87_v31  ;;  %v42_v7 = vadd.f32 %v424_v32, %v34_v3  ;;  %v50_v8 = vrot.slane %v45_v6, 1  ;;  %v59_v9 = vrot.slane %v45_v6, 7  ;;  %v79_v10 = vsel %vm68_vm0, %v69_v55, %v57_v63 }
  0x16   :  { %167 = vmatpush.msra.mxu1 %v103_v33  ;;  %197 = vmatpush.msra.mxu2 %v118_v36 }
  0x17   :  { %139 = vmatpush.msra.mxu0 %v86_v37  ;;  %274 = vmatpush.msra.mxu3 %v86_v37  ;;  %v46_v11 = vmax.f32 %v42_v7, 0.0  ;;  %v67_v12 = vsel %vm55_vm1, %v50_v8, %v59_v9 }
  0x18   :  { %168 = vmatpush.msra.mxu1 %v102_v38  ;;  %198 = vmatpush.msra.mxu2 %v117_v41 }
  0x19   :  { %140 = vmatpush.msra.mxu0 %v85_v42  ;;  %275 = vmatpush.msra.mxu3 %v85_v42  ;;  %v71_v13 = vrot.slane %v46_v11, 1  ;;  %v60_v14 = vrot.slane %v46_v11, 7 }
  0x1a   :  { %169 = vmatpush.msra.mxu1 %v101_v43  ;;  %199 = vmatpush.msra.mxu2 %v116_v47 }
  0x1b   :  { %141 = vmatpush.msra.mxu0 %v84_v48  ;;  %276 = vmatpush.msra.mxu3 %v84_v48  ;;  %v72_v15 = vsel %vm68_vm0, %v50_v8, %v71_v13  ;;  %v61_v16 = vsel %vm55_vm1, %v59_v9, %v60_v14  ;;  %v80_v17 = vsel %vm68_vm0, %v71_v13, %v60_v14 }
  0x1c   :  { %170 = vmatpush.msra.mxu1 %v100_v49  ;;  %200 = vmatpush.msra.mxu2 %v115_v50 }
  0x1d   :  { %142 = vmatpush.msra.mxu0 %v83_v51  ;;  %277 = vmatpush.msra.mxu3 %v83_v51 }
  0x1e   :  { %171 = vmatpush.msra.mxu1 %v99_v53  ;;  %201 = vmatpush.msra.mxu2 %v114_v56 }
  0x1f   :  { %143 = vmatpush.msra.mxu0 %v82_v57  ;;  %278 = vmatpush.msra.mxu3 %v82_v57 }
  0x20   :  { %172 = vmatpush.msra.mxu1 %v98_v60  ;;  %202 = vmatpush.msra.mxu2 %v113_v61 }
  0x21   :  { %144 = vmatpush.msra.mxu0 %v81_v62  ;;  %203 = vmatmul.f32.vlgmr.msra.gmra.mxu2 %v70_v1 }
  0x22   :  { %173 = vmatpush.msra.mxu1 %v97_v2  ;;  %145 = vmatmul.f32.vlgmr.msra.gmra.mxu0 %v66_v4 }
  0x23   :  { %174 = vmatmul.f32.vlgmr.msra.gmra.mxu1 %v43_v44  ;;  %279 = vmatpush.msra.mxu3 %v81_v62 }
  0x24   :  { %148 = vmatmul.f32.vlgmr.msra.gmra.mxu3 %v58_v5 }
  0x29   :  { %206 = vmatmul.f32.gmra.mxu2 %v79_v10 }
  0x2b   :  { %177 = vmatmul.f32.gmra.mxu1 %v451_v45 }
  0x2c   :  { %151 = vmatmul.f32.gmra.mxu3 %v67_v12 }
  0x31   :  { %209 = vmatmul.f32.gmra.mxu2 %v72_v15 }
  0x33   :  { %180 = vmatmul.f32.gmra.mxu1 %v45_v6 }
  0x34   :  { %154 = vmatmul.f32.gmra.mxu3 %v61_v16 }
  0x39   :  { %212 = vmatmul.f32.gmra.mxu2 %v80_v17 }
  0x3b   :  { %183 = vmatmul.f32.gmra.mxu1 %v46_v11 }
  0x9f   :  { %v146_v18 = vpop.f32.mrf.mxu0 }
  0xa0   :  { %v175_v19 = vpop.f32.mrf.mxu1 }
  0xa1   :  { %v176_v20 = vadd.f32 %v175_v19, %v146_v18 }
  0xa4   :  { %v204_v22 = vpop.f32.mrf.mxu2 }
  0xa5   :  { %v205_v23 = vadd.f32 %v204_v22, %v176_v20 }
  0xa7   :  { %v220_v24 = vadd.f32 %v282_v21, %v205_v23  ;;  %v149_v25 = vpop.f32.mrf.mxu3 }
  0xa8   :  { %v178_v26 = vpop.f32.mrf.mxu1 }
  0xa9   :  { %248 = vst [vmem:[%s536_s5] sm:$0xff] %v220_v24  ;;  %v179_v27 = vadd.f32 %v178_v26, %v149_v25  ;;  %v234_v42 = vmul.f32 %v220_v24, %v220_v24 }
  0xac   :  { %v207_v28 = vpop.f32.mrf.mxu2 }
  0xad   :  { %v208_v29 = vadd.f32 %v207_v28, %v179_v27 }
  0xaf   :  { %v221_v30 = vadd.f32 %v282_v21, %v208_v29  ;;  %v152_v31 = vpop.f32.mrf.mxu3 }
  0xb0   :  { %v181_v32 = vpop.f32.mrf.mxu1 }
  0xb1   :  { %249 = vst [vmem:[%s536_s5 + $0x8] sm:$0xff] %v221_v30  ;;  %v182_v33 = vadd.f32 %v181_v32, %v152_v31  ;;  %v235_v40 = vmul.f32 %v221_v30, %v221_v30  ;;  %v224_v43 = vadd.f32 %v221_v30, %v220_v24 }
  0xb3   :  { %v238_v46 = vadd.f32 %v235_v40, %v234_v42 }
  0xb4   :  { %v210_v34 = vpop.f32.mrf.mxu2 }
  0xb5   :  { %v211_v35 = vadd.f32 %v210_v34, %v182_v33 }
  0xb7   :  { %v222_v36 = vadd.f32 %v282_v21, %v211_v35  ;;  %v155_v37 = vpop.f32.mrf.mxu3 }
  0xb8   :  { %v184_v38 = vpop.f32.mrf.mxu1 }
  0xb9   :  { %250 = vst [vmem:[%s536_s5 + $0x10] sm:$0xff] %v222_v36  ;;  %v185_v39 = vadd.f32 %v184_v38, %v155_v37  ;;  %v236_v44 = vmul.f32 %v222_v36, %v222_v36  ;;  %v225_v47 = vadd.f32 %v224_v43, %v222_v36 }
  0xbb   :  { %v239_v49 = vadd.f32 %v238_v46, %v236_v44 }
  0xbc   :  { %v213_v41 = vpop.f32.mrf.mxu2 }
  0xbd   :  { %v214_v45 = vadd.f32 %v213_v41, %v185_v39 }
  0xbf   :  { %v223_v48 = vadd.f32 %v282_v21, %v214_v45 }
  0xc1   :  { %v226_v50 = vadd.f32 %v225_v47, %v223_v48  ;;  %v237_v51 = vmul.f32 %v223_v48, %v223_v48  ;;  %251 = vst [vmem:[%s536_s5 + $0x18] sm:$0xff] %v223_v48 }
  0xc3   :  { %v227_v52 = vrot.slane %v226_v50, 4  ;;  %v240_v53 = vadd.f32 %v239_v49, %v237_v51 }
  0xc5   :  { %v228_v54 = vadd.f32 %v227_v52, %v226_v50  ;;  %v241_v55 = vrot.slane %v240_v53, 4 }
  0xc7   :  { %v229_v56 = vrot.slane %v228_v54, 2  ;;  %v242_v57 = vadd.f32 %v241_v55, %v240_v53 }
  0xc9   :  { %v230_v58 = vadd.f32 %v229_v56, %v228_v54  ;;  %v243_v59 = vrot.slane %v242_v57, 2 }
  0xcb   :  { %v231_v60 = vrot.slane %v230_v58, 1  ;;  %v244_v61 = vadd.f32 %v243_v59, %v242_v57 }
  0xcd   :  { %v232_v62 = vadd.f32 %v231_v60, %v230_v58  ;;  %v245_v63 = vrot.slane %v244_v61, 1 }
  0xcf   :  { %233 = vst [vmem:[%s537_s6] sm:$0x1] %v232_v62  ;;  %v246_v0 = vadd.f32 %v245_v63, %v244_v61 }
  0xd1   :  { %247 = vst [vmem:[%s538_s7] sm:$0x1] %v246_v0 }

// kernel: _lambda_.6
= control target key start
LH: loop header
LB: loop body
LE: loop exit
PB: predicated region body
PF: predicated region fallthrough
CT: control target
= control target key end

     0   :  { %vm71_vm0 = vcmask 1046528   ;;  %vm58_vm1 = vcmask 1040384   ;;  %s559_s3 = inlined_call_operand.vmem [shape: f32[384,128], index: 3, kind: input, shape index: {}]   ;;  %s560_s0 = inlined_call_operand.vmem [shape: f32[2,16,128], index: 0, kind: input, shape index: {}]   ;;  %s561_s1 = inlined_call_operand.vmem [shape: f32[1,1,128], index: 1, kind: input, shape index: {}]   ;;  %s562_s2 = inlined_call_operand.vmem [shape: f32[1,1,128], index: 2, kind: input, shape index: {}]   ;;  %s563_s4 = inlined_call_operand.vmem [shape: f32[1,1,128], index: 4, kind: input, shape index: {}]   ;;  %s564_s5 = inlined_call_operand.vmem [shape: f32[2,16,128], index: 5, kind: input, shape index: {}]   ;;  %s565_s6 = inlined_call_operand.vmem [shape: f32[2,16,128], index: 6, kind: output, shape index: {0}]   ;;  %s566_s7 = inlined_call_operand.vmem [shape: f32[1,1,128], index: 7, kind: output, shape index: {1}]   ;;  %s567_s8 = inlined_call_operand.vmem [shape: f32[1,1,128], index: 8, kind: output, shape index: {2}]  }
   0x1   :  { %v131_v0 = vld [vmem:[%s559_s3 + $0x178] sm:$0xff]  ;;  %v130_v1 = vld [vmem:[%s559_s3 + $0x170] sm:$0xff]  ;;  %v129_v5 = vld [vmem:[%s559_s3 + $0x168] sm:$0xff] }
   0x2   :  { %v99_v2 = vld [vmem:[%s559_s3 + $0x78] sm:$0xff]  ;;  %190 = vmatpush.msra.mxu2 %v131_v0  ;;  %v98_v4 = vld [vmem:[%s559_s3 + $0x70] sm:$0xff]  ;;  %v97_v7 = vld [vmem:[%s559_s3 + $0x68] sm:$0xff] }
   0x3   :  { %132 = vmatpush.msra.mxu0 %v99_v2  ;;  %v115_v3 = vld [vmem:[%s559_s3 + $0xf8] sm:$0xff]  ;;  %275 = vmatpush.msra.mxu3 %v99_v2  ;;  %v114_v6 = vld [vmem:[%s559_s3 + $0xf0] sm:$0xff]  ;;  %v113_v8 = vld [vmem:[%s559_s3 + $0xe8] sm:$0xff] }
   0x4   :  { %161 = vmatpush.msra.mxu1 %v115_v3  ;;  %191 = vmatpush.msra.mxu2 %v130_v1  ;;  %v128_v9 = vld [vmem:[%s559_s3 + $0x160] sm:$0xff]  ;;  %v127_v12 = vld [vmem:[%s559_s3 + $0x158] sm:$0xff]  ;;  %v126_v15 = vld [vmem:[%s559_s3 + $0x150] sm:$0xff] }
   0x5   :  { %133 = vmatpush.msra.mxu0 %v98_v4  ;;  %276 = vmatpush.msra.mxu3 %v98_v4  ;;  %v96_v10 = vld [vmem:[%s559_s3 + $0x60] sm:$0xff]  ;;  %v95_v13 = vld [vmem:[%s559_s3 + $0x58] sm:$0xff]  ;;  %v94_v16 = vld [vmem:[%s559_s3 + $0x50] sm:$0xff] }
   0x6   :  { %162 = vmatpush.msra.mxu1 %v114_v6  ;;  %192 = vmatpush.msra.mxu2 %v129_v5  ;;  %v112_v11 = vld [vmem:[%s559_s3 + $0xe0] sm:$0xff]  ;;  %v111_v14 = vld [vmem:[%s559_s3 + $0xd8] sm:$0xff]  ;;  %v110_v17 = vld [vmem:[%s559_s3 + $0xd0] sm:$0xff] }
   0x7   :  { %134 = vmatpush.msra.mxu0 %v97_v7  ;;  %277 = vmatpush.msra.mxu3 %v97_v7  ;;  %v125_v18 = vld [vmem:[%s559_s3 + $0x148] sm:$0xff]  ;;  %v124_v21 = vld [vmem:[%s559_s3 + $0x140] sm:$0xff]  ;;  %v123_v23 = vld [vmem:[%s559_s3 + $0x138] sm:$0xff] }
   0x8   :  { %163 = vmatpush.msra.mxu1 %v113_v8  ;;  %193 = vmatpush.msra.mxu2 %v128_v9  ;;  %v93_v19 = vld [vmem:[%s559_s3 + $0x48] sm:$0xff]  ;;  %v92_v22 = vld [vmem:[%s559_s3 + $0x40] sm:$0xff]  ;;  %v122_v25 = vld [vmem:[%s559_s3 + $0x130] sm:$0xff] }
   0x9   :  { %135 = vmatpush.msra.mxu0 %v96_v10  ;;  %278 = vmatpush.msra.mxu3 %v96_v10  ;;  %v109_v20 = vld [vmem:[%s559_s3 + $0xc8] sm:$0xff]  ;;  %v108_v24 = vld [vmem:[%s559_s3 + $0xc0] sm:$0xff]  ;;  %v91_v26 = vld [vmem:[%s559_s3 + $0x38] sm:$0xff] }
   0xa   :  { %164 = vmatpush.msra.mxu1 %v112_v11  ;;  %194 = vmatpush.msra.mxu2 %v127_v12  ;;  %v107_v27 = vld [vmem:[%s559_s3 + $0xb8] sm:$0xff]  ;;  %v26_v28 = vld [vmem:[%s560_s0] sm:$0xff]  ;;  %v27_v29 = vld [vmem:[%s560_s0 + $0x8] sm:$0xff] }
   0xb   :  { %136 = vmatpush.msra.mxu0 %v95_v13  ;;  %279 = vmatpush.msra.mxu3 %v95_v13  ;;  %v432_v30 = vld [vmem:[%s561_s1] ss:$0 sm:$0xff]  ;;  %v90_v31 = vld [vmem:[%s559_s3 + $0x30] sm:$0xff]  ;;  %v121_v36 = vld [vmem:[%s559_s3 + $0x128] sm:$0xff] }
   0xc   :  { %165 = vmatpush.msra.mxu1 %v111_v14  ;;  %195 = vmatpush.msra.mxu2 %v126_v15  ;;  %v440_v32 = vld [vmem:[%s562_s2] ss:$0 sm:$0xff]  ;;  %v106_v33 = vld [vmem:[%s559_s3 + $0xb0] sm:$0xff]  ;;  %v34_v34 = vmul.f32 %v432_v30, %v26_v28  ;;  %v35_v35 = vmul.f32 %v432_v30, %v27_v29  ;;  %v89_v37 = vld [vmem:[%s559_s3 + $0x28] sm:$0xff] }
   0xd   :  { %137 = vmatpush.msra.mxu0 %v94_v16  ;;  %280 = vmatpush.msra.mxu3 %v94_v16  ;;  %v105_v38 = vld [vmem:[%s559_s3 + $0xa8] sm:$0xff]  ;;  %v120_v41 = vld [vmem:[%s559_s3 + $0x120] sm:$0xff]  ;;  %v28_v46 = vld [vmem:[%s560_s0 + $0x10] sm:$0xff] }
   0xe   :  { %166 = vmatpush.msra.mxu1 %v110_v17  ;;  %196 = vmatpush.msra.mxu2 %v125_v18  ;;  %v42_v39 = vadd.f32 %v440_v32, %v34_v34  ;;  %v43_v40 = vadd.f32 %v440_v32, %v35_v35  ;;  %v88_v42 = vld [vmem:[%s559_s3 + $0x20] sm:$0xff]  ;;  %v119_v47 = vld [vmem:[%s559_s3 + $0x118] sm:$0xff]  ;;  %v118_v50 = vld [vmem:[%s559_s3 + $0x110] sm:$0xff]  ;;  %v36_v52 = vmul.f32 %v432_v30, %v28_v46 }
   0xf   :  { %138 = vmatpush.msra.mxu0 %v93_v19  ;;  %281 = vmatpush.msra.mxu3 %v93_v19  ;;  %v104_v43 = vld [vmem:[%s559_s3 + $0xa0] sm:$0xff]  ;;  %v87_v48 = vld [vmem:[%s559_s3 + $0x18] sm:$0xff]  ;;  %v86_v51 = vld [vmem:[%s559_s3 + $0x10] sm:$0xff] }
  0x10   :  { %167 = vmatpush.msra.mxu1 %v109_v20  ;;  %197 = vmatpush.msra.mxu2 %v124_v21  ;;  %v46_v44 = vmax.f32 %v42_v39, 0.0  ;;  %v467_v45 = vmax.f32 %v43_v40, 0.0  ;;  %v103_v49 = vld [vmem:[%s559_s3 + $0x98] sm:$0xff]  ;;  %v102_v53 = vld [vmem:[%s559_s3 + $0x90] sm:$0xff]  ;;  %v117_v56 = vld [vmem:[%s559_s3 + $0x108] sm:$0xff]  ;;  %v44_v0 = vadd.f32 %v440_v32, %v36_v52 }
  0x11   :  { %139 = vmatpush.msra.mxu0 %v92_v22  ;;  %282 = vmatpush.msra.mxu3 %v92_v22  ;;  %v85_v57 = vld [vmem:[%s559_s3 + $0x8] sm:$0xff]  ;;  %v29_v59 = vld [vmem:[%s560_s0 + $0x18] sm:$0xff]  ;;  %v116_v61 = vld [vmem:[%s559_s3 + $0x100] sm:$0xff] }
  0x12   :  { %168 = vmatpush.msra.mxu1 %v108_v24  ;;  %198 = vmatpush.msra.mxu2 %v123_v23  ;;  %v52_v54 = vrot.slane %v46_v44, 1  ;;  %v72_v55 = vrot.slane %v467_v45, 1  ;;  %v59_v58 = vrot.slane %v46_v44, 7  ;;  %v101_v60 = vld [vmem:[%s559_s3 + $0x88] sm:$0xff]  ;;  %v84_v62 = vld [vmem:[%s559_s3] sm:$0xff]  ;;  %v60_v63 = vrot.slane %v467_v45, 7 }
  0x13   :  { %140 = vmatpush.msra.mxu0 %v91_v26  ;;  %283 = vmatpush.msra.mxu3 %v91_v26  ;;  %v100_v2 = vld [vmem:[%s559_s3 + $0x80] sm:$0xff]  ;;  %v37_v3 = vmul.f32 %v432_v30, %v29_v59  ;;  %v48_v6 = vmax.f32 %v44_v0, 0.0  ;;  %v229_v40 = vld [vmem:[%s564_s5 + $0x10] sm:$0xff] }
  0x14   :  { %169 = vmatpush.msra.mxu1 %v107_v27  ;;  %199 = vmatpush.msra.mxu2 %v122_v25  ;;  %v73_v1 = vsel %vm71_vm0, %v52_v54, %v72_v55  ;;  %v69_v4 = vsel %vm58_vm1, %v52_v54, %v59_v58  ;;  %v61_v5 = vsel %vm58_vm1, %v59_v58, %v60_v63  ;;  %v293_v21 = vld [vmem:[%s563_s4] ss:$0 sm:$0xff] }
  0x15   :  { %141 = vmatpush.msra.mxu0 %v90_v31  ;;  %284 = vmatpush.msra.mxu3 %v90_v31  ;;  %v45_v7 = vadd.f32 %v440_v32, %v37_v3  ;;  %v53_v8 = vrot.slane %v48_v6, 1  ;;  %v62_v9 = vrot.slane %v48_v6, 7  ;;  %v82_v10 = vsel %vm71_vm0, %v72_v55, %v60_v63  ;;  %v227_v24 = vld [vmem:[%s564_s5] sm:$0xff]  ;;  %v228_v32 = vld [vmem:[%s564_s5 + $0x8] sm:$0xff] }
  0x16   :  { %170 = vmatpush.msra.mxu1 %v106_v33  ;;  %200 = vmatpush.msra.mxu2 %v121_v36 }
  0x17   :  { %142 = vmatpush.msra.mxu0 %v89_v37  ;;  %285 = vmatpush.msra.mxu3 %v89_v37  ;;  %v49_v11 = vmax.f32 %v45_v7, 0.0  ;;  %v70_v12 = vsel %vm58_vm1, %v53_v8, %v62_v9 }
  0x18   :  { %171 = vmatpush.msra.mxu1 %v105_v38  ;;  %201 = vmatpush.msra.mxu2 %v120_v41 }
  0x19   :  { %143 = vmatpush.msra.mxu0 %v88_v42  ;;  %286 = vmatpush.msra.mxu3 %v88_v42  ;;  %v74_v13 = vrot.slane %v49_v11, 1  ;;  %v63_v14 = vrot.slane %v49_v11, 7 }
  0x1a   :  { %172 = vmatpush.msra.mxu1 %v104_v43  ;;  %202 = vmatpush.msra.mxu2 %v119_v47 }
  0x1b   :  { %144 = vmatpush.msra.mxu0 %v87_v48  ;;  %287 = vmatpush.msra.mxu3 %v87_v48  ;;  %v75_v15 = vsel %vm71_vm0, %v53_v8, %v74_v13  ;;  %v64_v16 = vsel %vm58_vm1, %v62_v9, %v63_v14  ;;  %v83_v17 = vsel %vm71_vm0, %v74_v13, %v63_v14 }
  0x1c   :  { %173 = vmatpush.msra.mxu1 %v103_v49  ;;  %203 = vmatpush.msra.mxu2 %v118_v50  ;;  %v230_v49 = vld [vmem:[%s564_s5 + $0x18] sm:$0xff] }
  0x1d   :  { %145 = vmatpush.msra.mxu0 %v86_v51  ;;  %288 = vmatpush.msra.mxu3 %v86_v51 }
  0x1e   :  { %174 = vmatpush.msra.mxu1 %v102_v53  ;;  %204 = vmatpush.msra.mxu2 %v117_v56 }
  0x1f   :  { %146 = vmatpush.msra.mxu0 %v85_v57  ;;  %289 = vmatpush.msra.mxu3 %v85_v57 }
  0x20   :  { %175 = vmatpush.msra.mxu1 %v101_v60  ;;  %205 = vmatpush.msra.mxu2 %v116_v61 }
  0x21   :  { %147 = vmatpush.msra.mxu0 %v84_v62  ;;  %206 = vmatmul.f32.vlgmr.msra.gmra.mxu2 %v73_v1 }
  0x22   :  { %176 = vmatpush.msra.mxu1 %v100_v2  ;;  %148 = vmatmul.f32.vlgmr.msra.gmra.mxu0 %v69_v4 }
  0x23   :  { %177 = vmatmul.f32.vlgmr.msra.gmra.mxu1 %v46_v44  ;;  %290 = vmatpush.msra.mxu3 %v84_v62 }
  0x24   :  { %151 = vmatmul.f32.vlgmr.msra.gmra.mxu3 %v61_v5 }
  0x29   :  { %209 = vmatmul.f32.gmra.mxu2 %v82_v10 }
  0x2b   :  { %180 = vmatmul.f32.gmra.mxu1 %v467_v45 }
  0x2c   :  { %154 = vmatmul.f32.gmra.mxu3 %v70_v12 }
  0x31   :  { %212 = vmatmul.f32.gmra.mxu2 %v75_v15 }
  0x33   :  { %183 = vmatmul.f32.gmra.mxu1 %v48_v6 }
  0x34   :  { %157 = vmatmul.f32.gmra.mxu3 %v64_v16 }
  0x39   :  { %215 = vmatmul.f32.gmra.mxu2 %v83_v17 }
  0x3b   :  { %186 = vmatmul.f32.gmra.mxu1 %v49_v11 }
  0x9f   :  { %v149_v18 = vpop.f32.mrf.mxu0 }
  0xa0   :  { %v178_v19 = vpop.f32.mrf.mxu1 }
  0xa1   :  { %v179_v20 = vadd.f32 %v178_v19, %v149_v18 }
  0xa4   :  { %v207_v22 = vpop.f32.mrf.mxu2 }
  0xa5   :  { %v208_v23 = vadd.f32 %v207_v22, %v179_v20 }
  0xa7   :  { %v223_v25 = vadd.f32 %v293_v21, %v208_v23  ;;  %v152_v26 = vpop.f32.mrf.mxu3 }
  0xa8   :  { %v181_v27 = vpop.f32.mrf.mxu1 }
  0xa9   :  { %v231_v28 = vadd.f32 %v227_v24, %v223_v25  ;;  %v182_v29 = vadd.f32 %v181_v27, %v152_v26 }
  0xab   :  { %259 = vst [vmem:[%s565_s6] sm:$0xff] %v231_v28  ;;  %v245_v50 = vmul.f32 %v231_v28, %v231_v28 }
  0xac   :  { %v210_v30 = vpop.f32.mrf.mxu2 }
  0xad   :  { %v211_v31 = vadd.f32 %v210_v30, %v182_v29 }
  0xaf   :  { %v224_v33 = vadd.f32 %v293_v21, %v211_v31  ;;  %v155_v34 = vpop.f32.mrf.mxu3 }
  0xb0   :  { %v184_v35 = vpop.f32.mrf.mxu1 }
  0xb1   :  { %v232_v36 = vadd.f32 %v228_v32, %v224_v33  ;;  %v185_v37 = vadd.f32 %v184_v35, %v155_v34 }
  0xb3   :  { %260 = vst [vmem:[%s565_s6 + $0x8] sm:$0xff] %v232_v36  ;;  %v246_v47 = vmul.f32 %v232_v36, %v232_v36  ;;  %v235_v51 = vadd.f32 %v232_v36, %v231_v28 }
  0xb4   :  { %v213_v38 = vpop.f32.mrf.mxu2 }
  0xb5   :  { %v214_v39 = vadd.f32 %v213_v38, %v185_v37  ;;  %v249_v54 = vadd.f32 %v246_v47, %v245_v50 }
  0xb7   :  { %v225_v41 = vadd.f32 %v293_v21, %v214_v39  ;;  %v158_v42 = vpop.f32.mrf.mxu3 }
  0xb8   :  { %v187_v43 = vpop.f32.mrf.mxu1 }
  0xb9   :  { %v233_v44 = vadd.f32 %v229_v40, %v225_v41  ;;  %v188_v45 = vadd.f32 %v187_v43, %v158_v42 }
  0xbb   :  { %261 = vst [vmem:[%s565_s6 + $0x10] sm:$0xff] %v233_v44  ;;  %v247_v52 = vmul.f32 %v233_v44, %v233_v44  ;;  %v236_v55 = vadd.f32 %v235_v51, %v233_v44 }
  0xbc   :  { %v216_v46 = vpop.f32.mrf.mxu2 }
  0xbd   :  { %v217_v48 = vadd.f32 %v216_v46, %v188_v45  ;;  %v250_v57 = vadd.f32 %v249_v54, %v247_v52 }
  0xbf   :  { %v226_v53 = vadd.f32 %v293_v21, %v217_v48 }
  0xc1   :  { %v234_v56 = vadd.f32 %v230_v49, %v226_v53 }
  0xc3   :  { %v237_v58 = vadd.f32 %v236_v55, %v234_v56  ;;  %v248_v59 = vmul.f32 %v234_v56, %v234_v56  ;;  %262 = vst [vmem:[%s565_s6 + $0x18] sm:$0xff] %v234_v56 }
  0xc5   :  { %v238_v60 = vrot.slane %v237_v58, 4  ;;  %v251_v61 = vadd.f32 %v250_v57, %v248_v59 }
  0xc7   :  { %v239_v62 = vadd.f32 %v238_v60, %v237_v58  ;;  %v252_v63 = vrot.slane %v251_v61, 4 }
  0xc9   :  { %v240_v0 = vrot.slane %v239_v62, 2  ;;  %v253_v1 = vadd.f32 %v252_v63, %v251_v61 }
  0xcb   :  { %v241_v2 = vadd.f32 %v240_v0, %v239_v62  ;;  %v254_v3 = vrot.slane %v253_v1, 2 }
  0xcd   :  { %v242_v4 = vrot.slane %v241_v2, 1  ;;  %v255_v5 = vadd.f32 %v254_v3, %v253_v1 }
  0xcf   :  { %v243_v6 = vadd.f32 %v242_v4, %v241_v2  ;;  %v256_v7 = vrot.slane %v255_v5, 1 }
  0xd1   :  { %244 = vst [vmem:[%s566_s7] sm:$0x1] %v243_v6  ;;  %v257_v8 = vadd.f32 %v256_v7, %v255_v5 }
  0xd3   :  { %258 = vst [vmem:[%s567_s8] sm:$0x1] %v257_v8 }

// kernel: _lambda_.4
= control target key start
LH: loop header
LB: loop body
LE: loop exit
PB: predicated region body
PF: predicated region fallthrough
CT: control target
= control target key end

     0   :  { %vm42_vm0 = vcmask 1046528   ;;  %vm29_vm1 = vcmask 1040384   ;;  %s470_s1 = inlined_call_operand.vmem [shape: f32[384,128], index: 1, kind: input, shape index: {}]   ;;  %s471_s0 = inlined_call_operand.vmem [shape: f32[2,16,128], index: 0, kind: input, shape index: {}]   ;;  %s472_s2 = inlined_call_operand.vmem [shape: f32[1,1,128], index: 2, kind: input, shape index: {}]   ;;  %s473_s3 = inlined_call_operand.vmem [shape: f32[2,16,128], index: 3, kind: output, shape index: {0}]   ;;  %s474_s4 = inlined_call_operand.vmem [shape: f32[1,1,128], index: 4, kind: output, shape index: {1}]   ;;  %s475_s5 = inlined_call_operand.vmem [shape: f32[1,1,128], index: 5, kind: output, shape index: {2}]  }
   0x1   :  { %v102_v0 = vld [vmem:[%s470_s1 + $0x178] sm:$0xff]  ;;  %v101_v1 = vld [vmem:[%s470_s1 + $0x170] sm:$0xff]  ;;  %v100_v5 = vld [vmem:[%s470_s1 + $0x168] sm:$0xff] }
   0x2   :  { %v70_v2 = vld [vmem:[%s470_s1 + $0x78] sm:$0xff]  ;;  %161 = vmatpush.msra.mxu2 %v102_v0  ;;  %v69_v4 = vld [vmem:[%s470_s1 + $0x70] sm:$0xff]  ;;  %v68_v7 = vld [vmem:[%s470_s1 + $0x68] sm:$0xff] }
   0x3   :  { %103 = vmatpush.msra.mxu0 %v70_v2  ;;  %v86_v3 = vld [vmem:[%s470_s1 + $0xf8] sm:$0xff]  ;;  %238 = vmatpush.msra.mxu3 %v70_v2  ;;  %v85_v6 = vld [vmem:[%s470_s1 + $0xf0] sm:$0xff]  ;;  %v84_v8 = vld [vmem:[%s470_s1 + $0xe8] sm:$0xff] }
   0x4   :  { %132 = vmatpush.msra.mxu1 %v86_v3  ;;  %162 = vmatpush.msra.mxu2 %v101_v1  ;;  %v99_v9 = vld [vmem:[%s470_s1 + $0x160] sm:$0xff]  ;;  %v98_v12 = vld [vmem:[%s470_s1 + $0x158] sm:$0xff]  ;;  %v97_v15 = vld [vmem:[%s470_s1 + $0x150] sm:$0xff] }
   0x5   :  { %104 = vmatpush.msra.mxu0 %v69_v4  ;;  %239 = vmatpush.msra.mxu3 %v69_v4  ;;  %v67_v10 = vld [vmem:[%s470_s1 + $0x60] sm:$0xff]  ;;  %v66_v13 = vld [vmem:[%s470_s1 + $0x58] sm:$0xff]  ;;  %v65_v16 = vld [vmem:[%s470_s1 + $0x50] sm:$0xff] }
   0x6   :  { %133 = vmatpush.msra.mxu1 %v85_v6  ;;  %163 = vmatpush.msra.mxu2 %v100_v5  ;;  %v83_v11 = vld [vmem:[%s470_s1 + $0xe0] sm:$0xff]  ;;  %v82_v14 = vld [vmem:[%s470_s1 + $0xd8] sm:$0xff]  ;;  %v81_v17 = vld [vmem:[%s470_s1 + $0xd0] sm:$0xff] }
   0x7   :  { %105 = vmatpush.msra.mxu0 %v68_v7  ;;  %240 = vmatpush.msra.mxu3 %v68_v7  ;;  %v96_v18 = vld [vmem:[%s470_s1 + $0x148] sm:$0xff]  ;;  %v95_v21 = vld [vmem:[%s470_s1 + $0x140] sm:$0xff]  ;;  %v94_v24 = vld [vmem:[%s470_s1 + $0x138] sm:$0xff] }
   0x8   :  { %134 = vmatpush.msra.mxu1 %v84_v8  ;;  %164 = vmatpush.msra.mxu2 %v99_v9  ;;  %v64_v19 = vld [vmem:[%s470_s1 + $0x48] sm:$0xff]  ;;  %v63_v22 = vld [vmem:[%s470_s1 + $0x40] sm:$0xff]  ;;  %v62_v25 = vld [vmem:[%s470_s1 + $0x38] sm:$0xff] }
   0x9   :  { %106 = vmatpush.msra.mxu0 %v67_v10  ;;  %241 = vmatpush.msra.mxu3 %v67_v10  ;;  %v80_v20 = vld [vmem:[%s470_s1 + $0xc8] sm:$0xff]  ;;  %v79_v23 = vld [vmem:[%s470_s1 + $0xc0] sm:$0xff]  ;;  %v78_v26 = vld [vmem:[%s470_s1 + $0xb8] sm:$0xff] }
   0xa   :  { %135 = vmatpush.msra.mxu1 %v83_v11  ;;  %165 = vmatpush.msra.mxu2 %v98_v12  ;;  %v93_v27 = vld [vmem:[%s470_s1 + $0x130] sm:$0xff]  ;;  %v92_v30 = vld [vmem:[%s470_s1 + $0x128] sm:$0xff]  ;;  %v91_v33 = vld [vmem:[%s470_s1 + $0x120] sm:$0xff] }
   0xb   :  { %107 = vmatpush.msra.mxu0 %v66_v13  ;;  %242 = vmatpush.msra.mxu3 %v66_v13  ;;  %v61_v28 = vld [vmem:[%s470_s1 + $0x30] sm:$0xff]  ;;  %v60_v31 = vld [vmem:[%s470_s1 + $0x28] sm:$0xff]  ;;  %v59_v34 = vld [vmem:[%s470_s1 + $0x20] sm:$0xff] }
   0xc   :  { %136 = vmatpush.msra.mxu1 %v82_v14  ;;  %166 = vmatpush.msra.mxu2 %v97_v15  ;;  %v77_v29 = vld [vmem:[%s470_s1 + $0xb0] sm:$0xff]  ;;  %v76_v32 = vld [vmem:[%s470_s1 + $0xa8] sm:$0xff]  ;;  %v90_v35 = vld [vmem:[%s470_s1 + $0x118] sm:$0xff] }
   0xd   :  { %108 = vmatpush.msra.mxu0 %v65_v16  ;;  %243 = vmatpush.msra.mxu3 %v65_v16  ;;  %v75_v36 = vld [vmem:[%s470_s1 + $0xa0] sm:$0xff]  ;;  %v58_v37 = vld [vmem:[%s470_s1 + $0x18] sm:$0xff]  ;;  %v18_v39 = vld [vmem:[%s471_s0 + $0x8] sm:$0xff] }
   0xe   :  { %137 = vmatpush.msra.mxu1 %v81_v17  ;;  %167 = vmatpush.msra.mxu2 %v96_v18  ;;  %v17_v38 = vld [vmem:[%s471_s0] sm:$0xff]  ;;  %v74_v40 = vld [vmem:[%s470_s1 + $0x98] sm:$0xff]  ;;  %v89_v41 = vld [vmem:[%s470_s1 + $0x110] sm:$0xff]  ;;  %v43_v45 = vrot.slane %v18_v39, 1  ;;  %v31_v52 = vrot.slane %v18_v39, 7 }
   0xf   :  { %109 = vmatpush.msra.mxu0 %v64_v19  ;;  %244 = vmatpush.msra.mxu3 %v64_v19  ;;  %v57_v42 = vld [vmem:[%s470_s1 + $0x10] sm:$0xff]  ;;  %v23_v44 = vrot.slane %v17_v38, 1  ;;  %v88_v46 = vld [vmem:[%s470_s1 + $0x108] sm:$0xff]  ;;  %v30_v48 = vrot.slane %v17_v38, 7  ;;  %v87_v50 = vld [vmem:[%s470_s1 + $0x100] sm:$0xff] }
  0x10   :  { %138 = vmatpush.msra.mxu1 %v80_v20  ;;  %168 = vmatpush.msra.mxu2 %v95_v21  ;;  %v73_v43 = vld [vmem:[%s470_s1 + $0x90] sm:$0xff]  ;;  %v56_v47 = vld [vmem:[%s470_s1 + $0x8] sm:$0xff]  ;;  %v55_v51 = vld [vmem:[%s470_s1] sm:$0xff]  ;;  %v53_v60 = vsel %vm42_vm0, %v43_v45, %v31_v52 }
  0x11   :  { %110 = vmatpush.msra.mxu0 %v63_v22  ;;  %245 = vmatpush.msra.mxu3 %v63_v22  ;;  %v72_v49 = vld [vmem:[%s470_s1 + $0x88] sm:$0xff]  ;;  %v44_v53 = vsel %vm42_vm0, %v23_v44, %v43_v45  ;;  %v71_v54 = vld [vmem:[%s470_s1 + $0x80] sm:$0xff]  ;;  %v40_v55 = vsel %vm29_vm1, %v23_v44, %v30_v48  ;;  %v32_v56 = vsel %vm29_vm1, %v30_v48, %v31_v52  ;;  %v19_v57 = vld [vmem:[%s471_s0 + $0x10] sm:$0xff] }
  0x12   :  { %139 = vmatpush.msra.mxu1 %v79_v23  ;;  %169 = vmatpush.msra.mxu2 %v94_v24  ;;  %v24_v58 = vrot.slane %v19_v57, 1  ;;  %v33_v59 = vrot.slane %v19_v57, 7  ;;  %v20_v61 = vld [vmem:[%s471_s0 + $0x18] sm:$0xff]  ;;  %v254_v7 = vld [vmem:[%s472_s2] ss:$0 sm:$0xff] }
  0x13   :  { %111 = vmatpush.msra.mxu0 %v62_v25  ;;  %246 = vmatpush.msra.mxu3 %v62_v25  ;;  %v45_v63 = vrot.slane %v20_v61, 1  ;;  %v34_v0 = vrot.slane %v20_v61, 7 }
  0x14   :  { %140 = vmatpush.msra.mxu1 %v78_v26  ;;  %170 = vmatpush.msra.mxu2 %v93_v27  ;;  %v41_v62 = vsel %vm29_vm1, %v24_v58, %v33_v59 }
  0x15   :  { %112 = vmatpush.msra.mxu0 %v61_v28  ;;  %247 = vmatpush.msra.mxu3 %v61_v28  ;;  %v46_v1 = vsel %vm42_vm0, %v24_v58, %v45_v63  ;;  %v35_v2 = vsel %vm29_vm1, %v33_v59, %v34_v0  ;;  %v54_v3 = vsel %vm42_vm0, %v45_v63, %v34_v0 }
  0x16   :  { %141 = vmatpush.msra.mxu1 %v77_v29  ;;  %171 = vmatpush.msra.mxu2 %v92_v30 }
  0x17   :  { %113 = vmatpush.msra.mxu0 %v60_v31  ;;  %248 = vmatpush.msra.mxu3 %v60_v31 }
  0x18   :  { %142 = vmatpush.msra.mxu1 %v76_v32  ;;  %172 = vmatpush.msra.mxu2 %v91_v33 }
  0x19   :  { %114 = vmatpush.msra.mxu0 %v59_v34  ;;  %249 = vmatpush.msra.mxu3 %v59_v34 }
  0x1a   :  { %143 = vmatpush.msra.mxu1 %v75_v36  ;;  %173 = vmatpush.msra.mxu2 %v90_v35 }
  0x1b   :  { %115 = vmatpush.msra.mxu0 %v58_v37  ;;  %250 = vmatpush.msra.mxu3 %v58_v37 }
  0x1c   :  { %144 = vmatpush.msra.mxu1 %v74_v40  ;;  %174 = vmatpush.msra.mxu2 %v89_v41 }
  0x1d   :  { %116 = vmatpush.msra.mxu0 %v57_v42  ;;  %251 = vmatpush.msra.mxu3 %v57_v42 }
  0x1e   :  { %145 = vmatpush.msra.mxu1 %v73_v43  ;;  %175 = vmatpush.msra.mxu2 %v88_v46 }
  0x1f   :  { %117 = vmatpush.msra.mxu0 %v56_v47  ;;  %252 = vmatpush.msra.mxu3 %v56_v47 }
  0x20   :  { %146 = vmatpush.msra.mxu1 %v72_v49  ;;  %176 = vmatpush.msra.mxu2 %v87_v50 }
  0x21   :  { %118 = vmatpush.msra.mxu0 %v55_v51  ;;  %177 = vmatmul.f32.vlgmr.msra.gmra.mxu2 %v44_v53 }
  0x22   :  { %147 = vmatpush.msra.mxu1 %v71_v54  ;;  %119 = vmatmul.f32.vlgmr.msra.gmra.mxu0 %v40_v55 }
  0x23   :  { %148 = vmatmul.f32.vlgmr.msra.gmra.mxu1 %v17_v38  ;;  %253 = vmatpush.msra.mxu3 %v55_v51 }
  0x24   :  { %122 = vmatmul.f32.vlgmr.msra.gmra.mxu3 %v32_v56 }
  0x29   :  { %180 = vmatmul.f32.gmra.mxu2 %v53_v60 }
  0x2b   :  { %151 = vmatmul.f32.gmra.mxu1 %v18_v39 }
  0x2c   :  { %125 = vmatmul.f32.gmra.mxu3 %v41_v62 }
  0x31   :  { %183 = vmatmul.f32.gmra.mxu2 %v46_v1 }
  0x33   :  { %154 = vmatmul.f32.gmra.mxu1 %v19_v57 }
  0x34   :  { %128 = vmatmul.f32.gmra.mxu3 %v35_v2 }
  0x39   :  { %186 = vmatmul.f32.gmra.mxu2 %v54_v3 }
  0x3b   :  { %157 = vmatmul.f32.gmra.mxu1 %v20_v61 }
  0x9f   :  { %v120_v4 = vpop.f32.mrf.mxu0 }
  0xa0   :  { %v149_v5 = vpop.f32.mrf.mxu1 }
  0xa1   :  { %v150_v6 = vadd.f32 %v149_v5, %v120_v4 }
  0xa4   :  { %v178_v8 = vpop.f32.mrf.mxu2 }
  0xa5   :  { %v179_v9 = vadd.f32 %v178_v8, %v150_v6 }
  0xa7   :  { %v194_v10 = vadd.f32 %v254_v7, %v179_v9  ;;  %v123_v11 = vpop.f32.mrf.mxu3 }
  0xa8   :  { %v152_v12 = vpop.f32.mrf.mxu1 }
  0xa9   :  { %222 = vst [vmem:[%s473_s3] sm:$0xff] %v194_v10  ;;  %v153_v13 = vadd.f32 %v152_v12, %v123_v11  ;;  %v208_v28 = vmul.f32 %v194_v10, %v194_v10 }
  0xac   :  { %v181_v14 = vpop.f32.mrf.mxu2 }
  0xad   :  { %v182_v15 = vadd.f32 %v181_v14, %v153_v13 }
  0xaf   :  { %v195_v16 = vadd.f32 %v254_v7, %v182_v15  ;;  %v126_v17 = vpop.f32.mrf.mxu3 }
  0xb0   :  { %v155_v18 = vpop.f32.mrf.mxu1 }
  0xb1   :  { %223 = vst [vmem:[%s473_s3 + $0x8] sm:$0xff] %v195_v16  ;;  %v156_v19 = vadd.f32 %v155_v18, %v126_v17  ;;  %v209_v26 = vmul.f32 %v195_v16, %v195_v16  ;;  %v198_v29 = vadd.f32 %v195_v16, %v194_v10 }
  0xb3   :  { %v212_v32 = vadd.f32 %v209_v26, %v208_v28 }
  0xb4   :  { %v184_v20 = vpop.f32.mrf.mxu2 }
  0xb5   :  { %v185_v21 = vadd.f32 %v184_v20, %v156_v19 }
  0xb7   :  { %v196_v22 = vadd.f32 %v254_v7, %v185_v21  ;;  %v129_v23 = vpop.f32.mrf.mxu3 }
  0xb8   :  { %v158_v24 = vpop.f32.mrf.mxu1 }
  0xb9   :  { %224 = vst [vmem:[%s473_s3 + $0x10] sm:$0xff] %v196_v22  ;;  %v159_v25 = vadd.f32 %v158_v24, %v129_v23  ;;  %v210_v30 = vmul.f32 %v196_v22, %v196_v22  ;;  %v199_v33 = vadd.f32 %v198_v29, %v196_v22 }
  0xbb   :  { %v213_v35 = vadd.f32 %v212_v32, %v210_v30 }
  0xbc   :  { %v187_v27 = vpop.f32.mrf.mxu2 }
  0xbd   :  { %v188_v31 = vadd.f32 %v187_v27, %v159_v25 }
  0xbf   :  { %v197_v34 = vadd.f32 %v254_v7, %v188_v31 }
  0xc1   :  { %v200_v36 = vadd.f32 %v199_v33, %v197_v34  ;;  %v211_v37 = vmul.f32 %v197_v34, %v197_v34  ;;  %225 = vst [vmem:[%s473_s3 + $0x18] sm:$0xff] %v197_v34 }
  0xc3   :  { %v201_v38 = vrot.slane %v200_v36, 4  ;;  %v214_v39 = vadd.f32 %v213_v35, %v211_v37 }
  0xc5   :  { %v202_v40 = vadd.f32 %v201_v38, %v200_v36  ;;  %v215_v41 = vrot.slane %v214_v39, 4 }
  0xc7   :  { %v203_v42 = vrot.slane %v202_v40, 2  ;;  %v216_v43 = vadd.f32 %v215_v41, %v214_v39 }
  0xc9   :  { %v204_v44 = vadd.f32 %v203_v42, %v202_v40  ;;  %v217_v45 = vrot.slane %v216_v43, 2 }
  0xcb   :  { %v205_v46 = vrot.slane %v204_v44, 1  ;;  %v218_v47 = vadd.f32 %v217_v45, %v216_v43 }
  0xcd   :  { %v206_v48 = vadd.f32 %v205_v46, %v204_v44  ;;  %v219_v49 = vrot.slane %v218_v47, 1 }
  0xcf   :  { %207 = vst [vmem:[%s474_s4] sm:$0x1] %v206_v48  ;;  %v220_v50 = vadd.f32 %v219_v49, %v218_v47 }
  0xd1   :  { %221 = vst [vmem:[%s475_s5] sm:$0x1] %v220_v50 }

</bundles_post_ra>
